<compile_context>
chip_gen: v7x
topology: tpu7x:2x2x1
jax: 0.10.0
libtpu: 0.0.40
codegen_flags: <defaults>
</compile_context>

<pallas_src>
import jax
import jax.numpy as jnp
from jax.experimental import pallas as pl
from jax.experimental.pallas import tpu as pltpu

FOLD = 8                       # batch rows folded into the lane dimension
_COMPUTE_DTYPE = jnp.bfloat16  # MXU operand dtype (accumulation stays f32)


def _mlp_kernel(x_ref, w1_ref, b1_ref, w2_ref, b2_ref, w3_ref, b3_ref, o_ref):
    # Fully fused hot path: 3 MXU matmuls (bf16 operands, f32 accumulate),
    # f32 bias adds and f32 ReLUs.  All tiles are lane dense (>=128 lanes).
    # x arrives as f32 straight from HBM; the bf16 cast happens here on the
    # VPU so the wrapper never does a separate cast pass over the batch.
    x = x_ref[...].astype(_COMPUTE_DTYPE)                             # (tg, FOLD*in)
    h1 = jnp.dot(x, w1_ref[...], preferred_element_type=jnp.float32) + b1_ref[...]
    h1 = jnp.maximum(h1, 0.0).astype(_COMPUTE_DTYPE)
    h2 = jnp.dot(h1, w2_ref[...], preferred_element_type=jnp.float32) + b2_ref[...]
    h2 = jnp.maximum(h2, 0.0).astype(_COMPUTE_DTYPE)
    y = jnp.dot(h2, w3_ref[...], preferred_element_type=jnp.float32) + b3_ref[...]
    o_ref[...] = y.astype(o_ref.dtype)                                # full-width vst
    # NOTE: at tg=256 the f32 intermediates (tg,512) spill to VMEM; per the
    # review this is only worth restructuring (inner fori_loop over pl.ds
    # sub-slices) if a bundle dump shows vld/vst slot saturation from spills.


def _block_diag(w, fold):
    """diag(w, w, ..., w) with `fold` copies -> shape (fold*in, fold*out)."""
    fi, fo = w.shape
    eye = jnp.eye(fold, dtype=w.dtype)
    return jnp.einsum("gh,io->giho", eye, w).reshape(fold * fi, fold * fo)


def prepare_params(params, fold=FOLD):
    """One-time param prep: block-diagonal bf16 weights + lane-tiled f32 biases."""
    return {
        "fold": fold,
        "in_size": params["w1"].shape[0],
        "layer_size": params["w1"].shape[1],
        "out_size": params["w3"].shape[1],
        "w1": _block_diag(params["w1"], fold).astype(_COMPUTE_DTYPE),
        "w2": _block_diag(params["w2"], fold).astype(_COMPUTE_DTYPE),
        "w3": _block_diag(params["w3"], fold).astype(_COMPUTE_DTYPE),
        "b1": jnp.tile(params["b1"].astype(jnp.float32), (1, fold)),
        "b2": jnp.tile(params["b2"].astype(jnp.float32), (1, fold)),
        "b3": jnp.tile(params["b3"].astype(jnp.float32), (1, fold)),
    }


def _choose_tg(G, tg_req):
    """Pick the slab-row tile.

    Constraints / goals:
      * tg is a multiple of 8 (sublanes) or equal to the full extent G;
      * at least 2 grid steps whenever possible (both v7x TensorCores busy);
      * even step count preferred;
      * scales down with small batches instead of a hard clamp.
    A partial last tile is fine: Pallas masks the partial output store and the
    garbage rows never mix into valid rows (the matmuls are row-local).
    """
    tg_req = max(8, (int(tg_req) // 8) * 8)
    if G <= 8:
        return G                                   # single full-extent block
    if G <= 2 * tg_req:
        # split into exactly 2 steps so both v7x TCs get work
        return min(tg_req, ((G + 1) // 2 + 7) // 8 * 8)
    steps = -(-G // tg_req)
    if steps % 2:                                  # nudge to an even step count
        alt = ((-(-G // (steps + 1))) + 7) // 8 * 8
        if alt >= 8:
            return alt
    return tg_req


def similarity_layer_forward(x, prepared, *, tile_b=2048, out_dtype=None):
    """x: (B, in_size) f32; prepared: output of prepare_params(init_params(...))."""
    B, in_size = x.shape
    fold = prepared["fold"]
    layer_size = prepared["layer_size"]
    out_size = prepared["out_size"]
    assert in_size == prepared["in_size"]
    out_dtype = x.dtype if out_dtype is None else out_dtype

    # Pad only to a multiple of `fold` (<= 7 rows; skipped when B % fold == 0)
    # so the lane-folding reshape is legal.  The grid handles ragged tiles.
    B8 = -(-B // fold) * fold
    if B8 != B:
        x = jnp.pad(x, ((0, B8 - B), (0, 0)))
    G = B8 // fold

    # Fold `fold` batch rows into the lane dim (free row-major reshape). Stays f32.
    x_slab = x.reshape(G, fold * in_size)

    tg = _choose_tg(G, max(1, int(tile_b)) // fold)
    grid = (pl.cdiv(G, tg),)

    def x_map(i):
        return (i, 0)

    def resident(i):          # constant block index -> stays VMEM-resident
        return (0, 0)

    # Advisory cost hint: actual MXU work on the block-diagonal operands and
    # real bytes moved (f32 x stream + output + resident params).
    flops = 2 * G * ((fold * in_size) * (fold * layer_size)
                     + (fold * layer_size) ** 2
                     + (fold * layer_size) * (fold * out_size))
    bytes_accessed = (
        x_slab.size * x_slab.dtype.itemsize
        + G * fold * out_size * jnp.dtype(out_dtype).itemsize
        + sum(prepared[k].size * prepared[k].dtype.itemsize
              for k in ("w1", "w2", "w3", "b1", "b2", "b3")))

    out_slab = pl.pallas_call(
        _mlp_kernel,
        out_shape=jax.ShapeDtypeStruct((G, fold * out_size), out_dtype),
        grid=grid,
        in_specs=[
            pl.BlockSpec((tg, fold * in_size), x_map),                    # x (streamed, f32)
            pl.BlockSpec((fold * in_size, fold * layer_size), resident),  # W1 block-diag
            pl.BlockSpec((1, fold * layer_size), resident),               # b1 tiled
            pl.BlockSpec((fold * layer_size, fold * layer_size), resident),
            pl.BlockSpec((1, fold * layer_size), resident),
            pl.BlockSpec((fold * layer_size, fold * out_size), resident),
            pl.BlockSpec((1, fold * out_size), resident),
        ],
        out_specs=pl.BlockSpec((tg, fold * out_size), x_map),             # lane-dense y
        compiler_params=pltpu.CompilerParams(
            dimension_semantics=("parallel",),  # megacore sharding on v7x
        ),
        cost_estimate=pl.CostEstimate(
            flops=flops, transcendentals=0, bytes_accessed=bytes_accessed),
    )(x_slab, prepared["w1"], prepared["b1"], prepared["w2"], prepared["b2"],
      prepared["w3"], prepared["b3"])

    # Un-fold (free reshape) and drop the <= 7 rows of fold padding (if any).
    return out_slab.reshape(B8, out_size)[:B]


def init_params(key, in_size, layer_size, out_size, dtype=jnp.float32):
    """Mimic torch.nn.Linear init: U(-1/sqrt(fan_in), +1/sqrt(fan_in)).
    Weights stored as (in_features, out_features) so y = x @ W + b."""
    ks = jax.random.split(key, 6)

    def lin(kw, kb, fan_in, fan_out):
        bound = fan_in ** -0.5
        w = jax.random.uniform(kw, (fan_in, fan_out), dtype, -bound, bound)
        b = jax.random.uniform(kb, (1, fan_out), dtype, -bound, bound)
        return w, b

    w1, b1 = lin(ks[0], ks[1], in_size, layer_size)
    w2, b2 = lin(ks[2], ks[3], layer_size, layer_size)
    w3, b3 = lin(ks[4], ks[5], layer_size, out_size)
    return {"w1": w1, "b1": b1, "w2": w2, "b2": b2, "w3": w3, "b3": b3}


def _reference(x, params):
    """Pure-JAX reference mirroring the kernel's bf16-operand / f32-accumulate path."""
    f32 = jnp.float32

    def q(a):  # bf16 quantization of matmul operands
        return a.astype(_COMPUTE_DTYPE).astype(f32)

    h = jnp.maximum(q(x) @ q(params["w1"]) + params["b1"].astype(f32), 0.0)
    h = jnp.maximum(q(h) @ q(params["w2"]) + params["b2"].astype(f32), 0.0)
    return q(h) @ q(params["w3"]) + params["b3"].astype(f32)


if __name__ == "__main__":
    # Shapes consistent with the module: in_size=32, layer_size=64, out_size=16.
    in_size, layer_size, out_size = 32, 64, 16
    B = 1024  # G=128 slab rows -> 2 even grid steps (both v7x TCs busy)

    key = jax.random.PRNGKey(0)
    kx, kp = jax.random.split(key)
    x = jax.random.normal(kx, (B, in_size), dtype=jnp.float32)
    params = init_params(kp, in_size, layer_size, out_size)
    prepared = prepare_params(params)

    y = jax.block_until_ready(similarity_layer_forward(x, prepared))
    y_ref = _reference(x, params)
    assert y.shape == (B, out_size)
    assert jnp.allclose(y, y_ref, atol=5e-3, rtol=5e-3), "mismatch vs JAX reference"

    # Partial last grid tile (B multiple of 8 but not of the tile).
    y3 = jax.block_until_ready(similarity_layer_forward(x[:1000], prepared))
    assert y3.shape == (1000, out_size)
    assert jnp.allclose(y3, y_ref[:1000], atol=5e-3, rtol=5e-3), "mismatch (partial tile)"

    # Small / ragged batch exercises the fold-padding path.
    y2 = jax.block_until_ready(similarity_layer_forward(x[:10], prepared))
    assert y2.shape == (10, out_size)
    assert jnp.allclose(y2, y_ref[:10], atol=5e-3, rtol=5e-3), "mismatch (padded path)"

    print("KERNEL_OK")
</pallas_src>

<mosaic_0001>
module attributes {stable_mosaic.version = 11 : i64} {
  func.func @_mlp_kernel(%arg0: i32, %arg1: memref<64x256xf32, #tpu.memory_space<vmem>>, %arg2: memref<256x512xbf16, #tpu.memory_space<vmem>>, %arg3: memref<1x512xf32, #tpu.memory_space<vmem>>, %arg4: memref<512x512xbf16, #tpu.memory_space<vmem>>, %arg5: memref<1x512xf32, #tpu.memory_space<vmem>>, %arg6: memref<512x128xbf16, #tpu.memory_space<vmem>>, %arg7: memref<1x128xf32, #tpu.memory_space<vmem>>, %arg8: memref<64x128xf32, #tpu.memory_space<vmem>>) attributes {dimension_semantics = [#tpu.dimension_semantics<parallel>], iteration_bounds = array<i64: 2>, scalar_prefetch = 0 : i64, scratch_operands = 0 : i64, tpu.core_type = #tpu.core_type<tc>, window_params = [{transform_indices = @transform_0, window_bounds = array<i64: 64, 256>}, {pipeline_mode = #tpu.pipeline_mode<synchronous>, transform_indices = @transform_1, window_bounds = array<i64: 256, 512>}, {pipeline_mode = #tpu.pipeline_mode<synchronous>, transform_indices = @transform_2, window_bounds = array<i64: 1, 512>}, {pipeline_mode = #tpu.pipeline_mode<synchronous>, transform_indices = @transform_3, window_bounds = array<i64: 512, 512>}, {pipeline_mode = #tpu.pipeline_mode<synchronous>, transform_indices = @transform_4, window_bounds = array<i64: 1, 512>}, {pipeline_mode = #tpu.pipeline_mode<synchronous>, transform_indices = @transform_5, window_bounds = array<i64: 512, 128>}, {pipeline_mode = #tpu.pipeline_mode<synchronous>, transform_indices = @transform_6, window_bounds = array<i64: 1, 128>}, {transform_indices = @transform_7, window_bounds = array<i64: 64, 128>}]} {
    %c0 = arith.constant 0 : index
    %c0_0 = arith.constant 0 : index
    %0 = vector.load %arg1[%c0, %c0_0] : memref<64x256xf32, #tpu.memory_space<vmem>>, vector<64x256xf32>
    %1 = arith.truncf %0 : vector<64x256xf32> to vector<64x256xbf16>
    %c0_1 = arith.constant 0 : index
    %c0_2 = arith.constant 0 : index
    %2 = vector.load %arg2[%c0_1, %c0_2] : memref<256x512xbf16, #tpu.memory_space<vmem>>, vector<256x512xbf16>
    %cst = arith.constant dense<0.000000e+00> : vector<64x512xf32>
    %3 = tpu.matmul %1, %2, %cst {dimension_numbers = #tpu.dot_dimension_numbers<[1], [0], [0], [1], [0, 0, 1, 1], [], []>} : vector<64x256xbf16>, vector<256x512xbf16>, vector<64x512xf32> -> vector<64x512xf32>
    %c0_3 = arith.constant 0 : index
    %c0_4 = arith.constant 0 : index
    %4 = vector.load %arg3[%c0_3, %c0_4] : memref<1x512xf32, #tpu.memory_space<vmem>>, vector<1x512xf32>
    %5 = vector.broadcast %4 : vector<1x512xf32> to vector<64x512xf32>
    %6 = arith.addf %3, %5 : vector<64x512xf32>
    %cst_5 = arith.constant 0.000000e+00 : f32
    %7 = vector.broadcast %cst_5 : f32 to vector<64x512xf32>
    %8 = arith.maximumf %6, %7 : vector<64x512xf32>
    %9 = arith.truncf %8 : vector<64x512xf32> to vector<64x512xbf16>
    %c0_6 = arith.constant 0 : index
    %c0_7 = arith.constant 0 : index
    %10 = vector.load %arg4[%c0_6, %c0_7] : memref<512x512xbf16, #tpu.memory_space<vmem>>, vector<512x512xbf16>
    %cst_8 = arith.constant dense<0.000000e+00> : vector<64x512xf32>
    %11 = tpu.matmul %9, %10, %cst_8 {dimension_numbers = #tpu.dot_dimension_numbers<[1], [0], [0], [1], [0, 0, 1, 1], [], []>} : vector<64x512xbf16>, vector<512x512xbf16>, vector<64x512xf32> -> vector<64x512xf32>
    %c0_9 = arith.constant 0 : index
    %c0_10 = arith.constant 0 : index
    %12 = vector.load %arg5[%c0_9, %c0_10] : memref<1x512xf32, #tpu.memory_space<vmem>>, vector<1x512xf32>
    %13 = vector.broadcast %12 : vector<1x512xf32> to vector<64x512xf32>
    %14 = arith.addf %11, %13 : vector<64x512xf32>
    %cst_11 = arith.constant 0.000000e+00 : f32
    %15 = vector.broadcast %cst_11 : f32 to vector<64x512xf32>
    %16 = arith.maximumf %14, %15 : vector<64x512xf32>
    %17 = arith.truncf %16 : vector<64x512xf32> to vector<64x512xbf16>
    %c0_12 = arith.constant 0 : index
    %c0_13 = arith.constant 0 : index
    %18 = vector.load %arg6[%c0_12, %c0_13] : memref<512x128xbf16, #tpu.memory_space<vmem>>, vector<512x128xbf16>
    %cst_14 = arith.constant dense<0.000000e+00> : vector<64x128xf32>
    %19 = tpu.matmul %17, %18, %cst_14 {dimension_numbers = #tpu.dot_dimension_numbers<[1], [0], [0], [1], [0, 0, 1, 1], [], []>} : vector<64x512xbf16>, vector<512x128xbf16>, vector<64x128xf32> -> vector<64x128xf32>
    %c0_15 = arith.constant 0 : index
    %c0_16 = arith.constant 0 : index
    %20 = vector.load %arg7[%c0_15, %c0_16] : memref<1x128xf32, #tpu.memory_space<vmem>>, vector<1x128xf32>
    %21 = vector.broadcast %20 : vector<1x128xf32> to vector<64x128xf32>
    %22 = arith.addf %19, %21 : vector<64x128xf32>
    %c0_17 = arith.constant 0 : index
    %c0_18 = arith.constant 0 : index
    %23 = vector.load %arg8[%c0_17, %c0_18] : memref<64x128xf32, #tpu.memory_space<vmem>>, vector<64x128xf32>
    tpu.vector_store %arg8[%c0_17, %c0_18], %22 {strides = array<i32>} : memref<64x128xf32, #tpu.memory_space<vmem>>, vector<64x128xf32>,
    return
  }
  func.func @transform_0(%arg0: i32) -> (i32, i32) {
    %c0_i32 = arith.constant 0 : i32
    %c0_i32_0 = arith.constant 0 : i32
    return %arg0, %c0_i32 : i32, i32
  }
  func.func @transform_1(%arg0: i32) -> (i32, i32) {
    %c0_i32 = arith.constant 0 : i32
    %c0_i32_0 = arith.constant 0 : i32
    %c0_i32_1 = arith.constant 0 : i32
    return %c0_i32, %c0_i32_0 : i32, i32
  }
  func.func @transform_2(%arg0: i32) -> (i32, i32) {
    %c0_i32 = arith.constant 0 : i32
    %c0_i32_0 = arith.constant 0 : i32
    %c0_i32_1 = arith.constant 0 : i32
    return %c0_i32, %c0_i32_0 : i32, i32
  }
  func.func @transform_3(%arg0: i32) -> (i32, i32) {
    %c0_i32 = arith.constant 0 : i32
    %c0_i32_0 = arith.constant 0 : i32
    %c0_i32_1 = arith.constant 0 : i32
    return %c0_i32, %c0_i32_0 : i32, i32
  }
  func.func @transform_4(%arg0: i32) -> (i32, i32) {
    %c0_i32 = arith.constant 0 : i32
    %c0_i32_0 = arith.constant 0 : i32
    %c0_i32_1 = arith.constant 0 : i32
    return %c0_i32, %c0_i32_0 : i32, i32
  }
  func.func @transform_5(%arg0: i32) -> (i32, i32) {
    %c0_i32 = arith.constant 0 : i32
    %c0_i32_0 = arith.constant 0 : i32
    %c0_i32_1 = arith.constant 0 : i32
    return %c0_i32, %c0_i32_0 : i32, i32
  }
  func.func @transform_6(%arg0: i32) -> (i32, i32) {
    %c0_i32 = arith.constant 0 : i32
    %c0_i32_0 = arith.constant 0 : i32
    %c0_i32_1 = arith.constant 0 : i32
    return %c0_i32, %c0_i32_0 : i32, i32
  }
  func.func @transform_7(%arg0: i32) -> (i32, i32) {
    %c0_i32 = arith.constant 0 : i32
    %c0_i32_0 = arith.constant 0 : i32
    return %arg0, %c0_i32 : i32, i32
  }
}

</mosaic_0001>

<bundles_post_ra>
// kernel: tpu_custom_call.1
= control target key start
LH: loop header
LB: loop body
LE: loop exit
PB: predicated region body
PF: predicated region fallthrough
CT: control target
= control target key end

     0   :  { %12 = vsyncpa [#allocation3], 0  ;;  %s4126_s0 = inlined_call_operand.hbm [shape: f32[128,256], index: 0, kind: input, shape index: {}]   ;;  %s4127_s1 = inlined_call_operand.hbm [shape: bf16[256,512], index: 1, kind: input, shape index: {}]   ;;  %s4128_s2 = inlined_call_operand.vmem [shape: f32[1,512], index: 2, kind: input, shape index: {}]   ;;  %s4129_s3 = inlined_call_operand.hbm [shape: bf16[512,512], index: 3, kind: input, shape index: {}]   ;;  %s4130_s4 = inlined_call_operand.vmem [shape: f32[1,512], index: 4, kind: input, shape index: {}]   ;;  %s4131_s5 = inlined_call_operand.hbm [shape: bf16[512,128], index: 5, kind: input, shape index: {}]   ;;  %s4132_s6 = inlined_call_operand.vmem [shape: f32[1,128], index: 6, kind: input, shape index: {}]   ;;  %s4133_s7 = inlined_call_operand.hbm [shape: f32[128,128], index: 7, kind: output, shape index: {}]  }
   0x1   :  { %14 = vsyncpa [#allocation3 + $0x1], 0 }
   0x2   :  { %15 = vsyncpa [#allocation6], 0 }
   0x3   :  { %16 = vsyncpa [#allocation9], 0 }
   0x4   :  { %17 = vsyncpa [#allocation4], 0 }
   0x5   :  { %19 = vsyncpa [#allocation4 + $0x1], 0  ;;  %s3653_s24 = smov 0   ;;  %s3655_s25 = smov 0  }
   0x6   :  { %s3657_s26 = smov 0   ;;  %s3659_s27 = smov 0  }
   0x7 LB: > { %s3674_s28 = sadd.s32 4294967295, %s3600_s27   ;;  %s2616_s29 = sadd.s32 4294967294, %s3600_s27   ;;  %s3600_s27 = sphi %s3659_s27, %s4159_s27   ;;  %s3596_s26 = sphi %s3657_s26, %s4158_s26   ;;  %s3592_s25 = sphi %s3655_s25, %s4157_s25   ;;  %s3588_s24 = sphi %s3653_s24, %s4156_s24  }
   0x8   : > { %p45_p0 = scmp.ne.s32.totalorder %s3592_s25, %s3588_s24  ;;  %p4134_p1 = scmp.eq.s32.totalorder %s3674_s28, 0 }
   0x9   : > { %p201_p3 = scmp.eq.s32.totalorder %s2616_s29, 1  ;;  %p2617_p5 = scmp.ge.s32.totalorder %s3600_s27, 1 }
   0xa   : > { %p3683_p4 = por %p4134_p1, %p45_p0  ;;  %p208_p7 = scmp.lt.s32.totalorder %s3600_s27, 3 }
   0xb   : > { %p3688_p6 = por %p201_p3, %p45_p0  ;;  %s3602_s10 = smov [#allocation5]  }
   0xc   : > { %s4138_s30 = scalar_select %p3683_p4, 1, 0 }
   0xd   : > { %s4139_s8 = scalar_select %p3688_p6, 1, 0 }
   0xe   : > { %p3693_p8 = pnand %p2617_p5, %p208_p7  ;;  %s220_s11 = sshll.u32 %s3602_s10, 4  ;;  %s3697_s11 = int_to_ptr.vmem [resolvable:$true] %s220_s11 }
   0xf   : > { %4140 = sst [smem:[#allocation15_spill]] %s4139_s8  ;;  %s3603_s13 = smov [#allocation7]  }
  0x10   : > { %s4141_s9 = scalar_select %p3693_p8, 1, 0 }
  0x11   : > { %p3025_p9 = pneg %p3693_p8  ;;  %s236_s14 = sshll.u32 %s3603_s13, 4  ;;  %s3708_s14 = int_to_ptr.vmem [resolvable:$true] %s236_s14 }
  0x12   : > { %s3604_s15 = smov [#allocation8]   ;;  %s3412_s19 = scalar_lea.hbm %s4127_s1, 8192 }
  0x13   : > { %p3704_p11 = pnand %p3025_p9, %p4134_p1  ;;  %s3710_s16 = sshll.u32 %s3604_s15, 4  ;;  %s253_s16 = int_to_ptr.vmem [resolvable:$true] %s3710_s16 }
  0x14   : > { %p3413_p12 = scmp.ne.s32.totalorder %s4127_s1, %s3412_s19  ;;  %p3419_p5 = scmp.lt.u32.totalorder %s3412_s19, %s4127_s1 }
  0x15   : > { %p3720_p13 = pneg %p3704_p11 }
  0x17   : > { %p3415_p0 = pnand %p3720_p13, %p3413_p12 }
  0x19   : > { %p3416_p3 = pneg %p3415_p0 }
  0x1b   : > { %p3421_p7 = pnand %p3419_p5, %p3416_p3 }
  0x1d   : > { %3424 = shalt.err (!%p3421_p7)
}
  0x1e   : > { %s3425_s10 = scalar_lea.vmem %s3697_s11, 8192  ;;  %p3433_p2 = scmp.lt.s32.totalorder %s3697_s11, %s3697_s11 }
  0x1f   : > { %p3426_p9 = scmp.ne.s32.totalorder %s3697_s11, %s3425_s10  ;;  %p3434_p6 = scmp.lt.s32.totalorder %s3425_s10, %s3425_s10 }
  0x21   : > { %p3428_p10 = pnand %p3426_p9, %p3720_p13  ;;  %p3435_p12 = por %p3434_p6, %p3433_p2 }
  0x23   : > { %p3429_p1 = pneg %p3428_p10 }
  0x25   : > { %p3436_p0 = pnand %p3435_p12, %p3429_p1 }
  0x27   : > { %3439 = shalt.err (!%p3436_p0)
}
  0x28   : > { %s3605_s13 = smov 256   ;;  %s3606_s15 = smov 16  }
  0x29   : > { %3028 = dma.hbm_to_vmem [thread:$0]  (!%p3704_p11), %s4127_s1, 8192, %s3697_s11, [#allocation6], %s3605_s13, %s3605_s13, %s3606_s15  }
  0x2a   : > { %s3440_s21 = scalar_lea.hbm %s4129_s3, 16384 }
  0x2b   : > { %p3441_p1 = scmp.ne.s32.totalorder %s4129_s3, %s3440_s21  ;;  %p3447_p10 = scmp.lt.u32.totalorder %s3440_s21, %s4129_s3 }
  0x2d   : > { %p3443_p2 = pnand %p3441_p1, %p3720_p13 }
  0x2f   : > { %p3444_p6 = pneg %p3443_p2 }
  0x31   : > { %p3449_p3 = pnand %p3447_p10, %p3444_p6 }
  0x33   : > { %3452 = shalt.err (!%p3449_p3)
}
  0x34   : > { %s3453_s11 = scalar_lea.vmem %s3708_s14, 16384  ;;  %p3461_p12 = scmp.lt.s32.totalorder %s3708_s14, %s3708_s14 }
  0x35   : > { %p3454_p5 = scmp.ne.s32.totalorder %s3708_s14, %s3453_s11  ;;  %p3462_p0 = scmp.lt.s32.totalorder %s3453_s11, %s3453_s11 }
  0x37   : > { %p3456_p7 = pnand %p3454_p5, %p3720_p13  ;;  %p3463_p1 = por %p3462_p0, %p3461_p12 }
  0x39   : > { %p3457_p9 = pneg %p3456_p7 }
  0x3b   : > { %p3464_p2 = pnand %p3463_p1, %p3457_p9 }
  0x3d   : > { %3467 = shalt.err (!%p3464_p2)
}
  0x3e   : > { %3031 = dma.hbm_to_vmem [thread:$0]  (!%p3704_p11), %s4129_s3, 16384, %s3708_s14, [#allocation6], %s3605_s13, %s3605_s13, %s3606_s15  }
  0x3f   : > { %s3468_s20 = scalar_lea.hbm %s4131_s5, 4096 }
  0x40   : > { %p3469_p6 = scmp.ne.s32.totalorder %s4131_s5, %s3468_s20  ;;  %p3475_p5 = scmp.lt.u32.totalorder %s3468_s20, %s4131_s5 }
  0x42   : > { %p3471_p10 = pnand %p3469_p6, %p3720_p13 }
  0x44   : > { %p3472_p3 = pneg %p3471_p10 }
  0x46   : > { %p3477_p7 = pnand %p3475_p5, %p3472_p3 }
  0x48   : > { %3480 = shalt.err (!%p3477_p7)
}
  0x49   : > { %s3481_s11 = scalar_lea.vmem %s253_s16, 4096  ;;  %p3489_p1 = scmp.lt.s32.totalorder %s253_s16, %s253_s16 }
  0x4a   : > { %p3482_p9 = scmp.ne.s32.totalorder %s253_s16, %s3481_s11  ;;  %p3490_p2 = scmp.lt.s32.totalorder %s3481_s11, %s3481_s11 }
  0x4c   : > { %p3484_p12 = pnand %p3482_p9, %p3720_p13  ;;  %p3491_p4 = por %p3490_p2, %p3489_p1 }
  0x4e   : > { %p3485_p0 = pneg %p3484_p12 }
  0x50   : > { %p3492_p8 = pnand %p3491_p4, %p3485_p0 }
  0x52   : > { %3495 = shalt.err (!%p3492_p8)
}
  0x53   : > { %s3607_s14 = smov 64   ;;  %s3608_s22 = smov 4  }
  0x54   : > { %3034 = dma.hbm_to_vmem [thread:$0]  (!%p3704_p11), %s4131_s5, 4096, %s253_s16, [#allocation9], %s3607_s14, %s3607_s14, %s3608_s22  }
  0x55   : > { %s3790_s18 = sadd.s32 1, %s3600_s27   ;;  %s32_s20 = sadd.s32 1, %s3596_s26 }
  0x56   : > { %s29_s19 = ssub.s32 %s3600_s27, %s3790_s18  ;;  %p39_p8 = scmp.ne.s32.totalorder %s3596_s26, %s3592_s25 }
  0x57   : > { %p30_p4 = scmp.eq.s32.totalorder %s29_s19, 0  ;;  %p40_p13 = scmp.eq.s32.totalorder %s3600_s27, 0 }
  0x58   : > { %p3046_p6 = scmp.lt.s32.totalorder %s3600_s27, 2  ;;  %p4144_p3 = scmp.eq.s32.totalorder %s3674_s28, 1 }
  0x59   : > { %s3800_s21 = scalar_select %p30_p4, %s3596_s26, %s32_s20  }
  0x5a   : > { %p41_p10 = por %p40_p13, %p39_p8  ;;  %p3804_p5 = por %p4144_p3, %p39_p8 }
  0x5b   : > { %s269_s12 = sand.u32 1, %s3596_s26   ;;  %s2863_s29 = sshll.u32 %s3600_s27, 11 }
  0x5c   : > { %s2622_s16 = sshll.u32 %s269_s12, 7  ;;  %s3813_s14 = scalar_lea.hbm %s4126_s0, %s2863_s29 }
  0x5d   : > { %s273_s22 = scalar_lea.vmem [#allocation2], %s2622_s16  ;;  %p3815_p11 = pnand %p3046_p6, %p41_p10 }
  0x5e   : > { %s281_s8 = sshll.u32 %s273_s22, 4  ;;  %s3821_s19 = scalar_lea.sflag [#allocation3], %s269_s12  ;;  %s3819_s8 = int_to_ptr.vmem [resolvable:$true] %s281_s8 }
  0x5f   : > { %s3496_s20 = scalar_lea.hbm %s3813_s14, 2048  ;;  %p3498_p9 = pneg %p3815_p11 }
  0x60   : > { %p3497_p7 = scmp.ne.s32.totalorder %s3813_s14, %s3496_s20  ;;  %s3501_s10 = scalar_lea.hbm %s4126_s0, 4096 }
  0x61   : > { %p3502_p1 = scmp.lt.u32.totalorder %s3813_s14, %s4126_s0  ;;  %p3503_p2 = scmp.lt.u32.totalorder %s3501_s10, %s3496_s20 }
  0x62   : > { %p3499_p12 = pnand %p3498_p9, %p3497_p7  ;;  %p3505_p8 = scmp.lt.u32.totalorder %s3496_s20, %s3813_s14 }
  0x63   : > { %p3504_p4 = por %p3503_p2, %p3502_p1 }
  0x64   : > { %p3500_p0 = pneg %p3499_p12 }
  0x65   : > { %p3506_p13 = por %p3505_p8, %p3504_p4 }
  0x67   : > { %p3507_p6 = pnand %p3506_p13, %p3500_p0 }
  0x69   : > { %3510 = shalt.err (!%p3507_p6)
}
  0x6a   : > { %s3511_s12 = scalar_lea.vmem %s3819_s8, 2048  ;;  %s3609_s29 = smov [#allocation2]  }
  0x6b   : > { %p3512_p10 = scmp.ne.s32.totalorder %s3819_s8, %s3511_s12  ;;  %s3516_s16 = sshll.u32 %s3609_s29, 4  ;;  %s3517_s16 = int_to_ptr.vmem [resolvable:$false] %s3516_s16 }
  0x6c   : > { %s3518_s11 = scalar_lea.vmem %s3517_s16, 4096  ;;  %p3519_p12 = scmp.lt.s32.totalorder %s3819_s8, %s3517_s16 }
  0x6d   : > { %p3514_p3 = pnand %p3512_p10, %p3498_p9  ;;  %p3520_p1 = scmp.lt.s32.totalorder %s3518_s11, %s3511_s12 }
  0x6f   : > { %p3515_p7 = pneg %p3514_p3  ;;  %p3521_p2 = por %p3520_p1, %p3519_p12 }
  0x71   : > { %p3522_p4 = pnand %p3521_p2, %p3515_p7 }
  0x73   : > { %3525 = shalt.err (!%p3522_p4)
}
  0x74   : > { %3038 = dma.hbm_to_vmem [thread:$0]  (!%p3815_p11), %s3813_s14, 2048, %s3819_s8, %s3821_s19, %s3605_s13, %s3605_s13, %s3606_s15  }
  0x75   : > { %p4147_p9 = scmp.ne.s32.totalorder %s4141_s9, 0 }
  0x76   : > { %s3855_s20 = sand.u32 (!%p4147_p9), 1, %s3592_s25   ;;  %p4148_p0 = scmp.ne.s32.totalorder (!%p4147_p9), %s4138_s30, 0 }
  0x77   : > { %293 = sbr.rel (%p4147_p9) target bundleno = 967 (0x3c7), region = 48  ;;  %s2627_s10 = sshll.u32 (!%p4147_p9), %s3855_s20, 7 }
  0x78   : > { %s296_s22 = scalar_lea.sflag (!%p4147_p9), [#allocation3], %s3855_s20  ;;  %s3859_s12 = scalar_lea.vmem (!%p4147_p9), [#allocation2], %s2627_s10 }
  0x7e   : > { %3571 = dma.done.wait (%p4148_p0), %s296_s22, 2048  }
  0x7f   : > { %3573 = vsyncadd (%p4148_p0), %s296_s22, 4294965248  ;;  %p4149_p11 = scmp.eq.s32.totalorder %s3674_s28, 0 }
  0x81   : > { %3575 = dma.done.wait (%p4149_p11), [#allocation6], 24576   ;;  %p4150_p8 = pmov %p4149_p11 }
  0x83   : > { %3577 = vsyncadd (%p4150_p8), [#allocation6], 4294942720  ;;  %p4151_p13 = pmov %p4150_p8 }
  0x84   : > { %p4152_p6 = pmov %p4150_p8 }
  0x85   : > { %3579 = dma.done.wait (%p4151_p13), [#allocation9], 4096  }
  0x86   : > { %3581 = vsyncadd (%p4152_p6), [#allocation9], 4294963200  ;;  %v3092_v0 = vld [vmem:[#allocation5 + $0x4] ss:$16 sps:$4 sm:$0xff]   ;;  %v3094_v1 = vld [vmem:[#allocation5] ss:$16 sps:$4 sm:$0xff]  }
  0x87   : > { %775 = vmatprep.subr.bf16.mxu0 %v3092_v0  ;;  %v3095_v2 = vld [vmem:[#allocation5 + $0x24] ss:$16 sps:$4 sm:$0xff]   ;;  %v3097_v3 = vld [vmem:[#allocation5 + $0x20] ss:$16 sps:$4 sm:$0xff]   ;;  %v3139_v13 = vld [vmem:[#allocation5 + $0xc] ss:$16 sps:$4 sm:$0xff]  }
  0x88   : > { %776 = vmatpush1.bf16.msra.mxu0 %v3094_v1  ;;  %v3098_v4 = vld [vmem:[#allocation5 + $0x44] ss:$16 sps:$4 sm:$0xff]   ;;  %v3100_v5 = vld [vmem:[#allocation5 + $0x40] ss:$16 sps:$4 sm:$0xff]   ;;  %v3142_v14 = vld [vmem:[#allocation5 + $0x8] ss:$16 sps:$4 sm:$0xff]   ;;  %848 = vmatprep.subr.bf16.mxu1 %v3139_v13 }
  0x89   : > { %777 = vmatprep.subr.bf16.mxu0 %v3095_v2  ;;  %v3101_v6 = vld [vmem:[#allocation5 + $0x64] ss:$16 sps:$4 sm:$0xff]   ;;  %v3103_v7 = vld [vmem:[#allocation5 + $0x60] ss:$16 sps:$4 sm:$0xff]   ;;  %v346_v15 = vld [vmem:[%s3859_s12 + $0x8] sm:$0xff]  ;;  %849 = vmatpush1.bf16.msra.mxu1 %v3142_v14  ;;  %s2631_s17 = sshll.u32 %s3855_s20, 6 }
  0x8a   : > { %v3104_v8 = vld [vmem:[#allocation5 + $0x84] ss:$16 sps:$4 sm:$0xff]   ;;  %v3106_v9 = vld [vmem:[#allocation5 + $0x80] ss:$16 sps:$4 sm:$0xff]   ;;  %v348_v18 = vld [vmem:[%s3859_s12 + $0x18] sm:$0xff]  ;;  %s4059_s19 = scalar_lea.vmem [#allocation10], %s2631_s17 }
  0x8b   : > { %v3107_v10 = vld [vmem:[#allocation5 + $0xa4] ss:$16 sps:$4 sm:$0xff]   ;;  %v3109_v11 = vld [vmem:[#allocation5 + $0xa0] ss:$16 sps:$4 sm:$0xff]   ;;  %v362_v19 = vpack.c.bf16 %v348_v18, %v346_v15  ;;  %v3143_v20 = vld [vmem:[#allocation5 + $0x2c] ss:$16 sps:$4 sm:$0xff]  }
  0x8c   : > { %778 = vmatpush1.bf16.msra.mxu0 %v3097_v3  ;;  %v3110_v12 = vld [vmem:[#allocation5 + $0xc4] ss:$16 sps:$4 sm:$0xff]   ;;  %v3112_v16 = vld [vmem:[#allocation5 + $0xc0] ss:$16 sps:$4 sm:$0xff]   ;;  %v3145_v21 = vld [vmem:[#allocation5 + $0x28] ss:$16 sps:$4 sm:$0xff]   ;;  %850 = vmatprep.subr.bf16.mxu1 %v3143_v20 }
  0x8d   : > { %779 = vmatprep.subr.bf16.mxu0 %v3098_v4  ;;  %v3113_v17 = vld [vmem:[#allocation5 + $0xe4] ss:$16 sps:$4 sm:$0xff]   ;;  %807 = vmatprep.mubr.bf16.mxu0 %v362_v19  ;;  %v3146_v22 = vld [vmem:[#allocation5 + $0x4c] ss:$16 sps:$4 sm:$0xff]   ;;  %v3115_v23 = vld [vmem:[#allocation5 + $0xe0] ss:$16 sps:$4 sm:$0xff]  }
  0x8e   : > { %v3116_v24 = vld [vmem:[#allocation5 + $0x104] ss:$16 sps:$4 sm:$0xff]   ;;  %880 = vmatprep.mubr.bf16.mxu1 %v362_v19  ;;  %851 = vmatpush1.bf16.msra.mxu1 %v3145_v21  ;;  %v3148_v25 = vld [vmem:[#allocation5 + $0x48] ss:$16 sps:$4 sm:$0xff]   ;;  %v3149_v26 = vld [vmem:[#allocation5 + $0x6c] ss:$16 sps:$4 sm:$0xff]  }
  0x8f   : > { %852 = vmatprep.subr.bf16.mxu1 %v3146_v22  ;;  %v3118_v27 = vld [vmem:[#allocation5 + $0x100] ss:$16 sps:$4 sm:$0xff]   ;;  %v3119_v28 = vld [vmem:[#allocation5 + $0x124] ss:$16 sps:$4 sm:$0xff]   ;;  %v3151_v29 = vld [vmem:[#allocation5 + $0x68] ss:$16 sps:$4 sm:$0xff]  }
  0x90   : > { %780 = vmatpush1.bf16.msra.mxu0 %v3100_v5  ;;  %v3152_v30 = vld [vmem:[#allocation5 + $0x8c] ss:$16 sps:$4 sm:$0xff]   ;;  %v3121_v31 = vld [vmem:[#allocation5 + $0x120] ss:$16 sps:$4 sm:$0xff]   ;;  %v3122_v32 = vld [vmem:[#allocation5 + $0x144] ss:$16 sps:$4 sm:$0xff]  }
  0x91   : > { %781 = vmatprep.subr.bf16.mxu0 %v3101_v6  ;;  %v3154_v33 = vld [vmem:[#allocation5 + $0x88] ss:$16 sps:$4 sm:$0xff]   ;;  %v3155_v34 = vld [vmem:[#allocation5 + $0xac] ss:$16 sps:$4 sm:$0xff]   ;;  %v3124_v35 = vld [vmem:[#allocation5 + $0x140] ss:$16 sps:$4 sm:$0xff]  }
  0x92   : > { %853 = vmatpush1.bf16.msra.mxu1 %v3148_v25  ;;  %v3125_v36 = vld [vmem:[#allocation5 + $0x164] ss:$16 sps:$4 sm:$0xff]   ;;  %v3157_v37 = vld [vmem:[#allocation5 + $0xa8] ss:$16 sps:$4 sm:$0xff]   ;;  %v3158_v38 = vld [vmem:[#allocation5 + $0xcc] ss:$16 sps:$4 sm:$0xff]  }
  0x93   : > { %854 = vmatprep.subr.bf16.mxu1 %v3149_v26  ;;  %v3127_v39 = vld [vmem:[#allocation5 + $0x160] ss:$16 sps:$4 sm:$0xff]   ;;  %v3128_v40 = vld [vmem:[#allocation5 + $0x184] ss:$16 sps:$4 sm:$0xff]   ;;  %v3160_v41 = vld [vmem:[#allocation5 + $0xc8] ss:$16 sps:$4 sm:$0xff]  }
  0x94   : > { %782 = vmatpush1.bf16.msra.mxu0 %v3103_v7  ;;  %v3161_v42 = vld [vmem:[#allocation5 + $0xec] ss:$16 sps:$4 sm:$0xff]   ;;  %v3130_v43 = vld [vmem:[#allocation5 + $0x180] ss:$16 sps:$4 sm:$0xff]   ;;  %v3131_v44 = vld [vmem:[#allocation5 + $0x1a4] ss:$16 sps:$4 sm:$0xff]  }
  0x95   : > { %783 = vmatprep.subr.bf16.mxu0 %v3104_v8  ;;  %v3163_v45 = vld [vmem:[#allocation5 + $0xe8] ss:$16 sps:$4 sm:$0xff]   ;;  %v3164_v46 = vld [vmem:[#allocation5 + $0x10c] ss:$16 sps:$4 sm:$0xff]   ;;  %v3133_v47 = vld [vmem:[#allocation5 + $0x1a0] ss:$16 sps:$4 sm:$0xff]  }
  0x96   : > { %855 = vmatpush1.bf16.msra.mxu1 %v3151_v29  ;;  %v3134_v48 = vld [vmem:[#allocation5 + $0x1c4] ss:$16 sps:$4 sm:$0xff]   ;;  %v3166_v49 = vld [vmem:[#allocation5 + $0x108] ss:$16 sps:$4 sm:$0xff]   ;;  %v3167_v50 = vld [vmem:[#allocation5 + $0x12c] ss:$16 sps:$4 sm:$0xff]  }
  0x97   : > { %856 = vmatprep.subr.bf16.mxu1 %v3152_v30  ;;  %v3136_v51 = vld [vmem:[#allocation5 + $0x1c0] ss:$16 sps:$4 sm:$0xff]   ;;  %v3137_v52 = vld [vmem:[#allocation5 + $0x1e4] ss:$16 sps:$4 sm:$0xff]   ;;  %v3169_v53 = vld [vmem:[#allocation5 + $0x128] ss:$16 sps:$4 sm:$0xff]  }
  0x98   : > { %784 = vmatpush1.bf16.msra.mxu0 %v3106_v9  ;;  %v3141_v54 = vld [vmem:[#allocation5 + $0x1e0] ss:$16 sps:$4 sm:$0xff]   ;;  %v3170_v56 = vld [vmem:[#allocation5 + $0x14c] ss:$16 sps:$4 sm:$0xff]   ;;  %v3172_v60 = vld [vmem:[#allocation5 + $0x148] ss:$16 sps:$4 sm:$0xff]  }
  0x99   : > { %785 = vmatprep.subr.bf16.mxu0 %v3107_v10  ;;  %v345_v55 = vld [vmem:[%s3859_s12] sm:$0xff]  ;;  %v347_v57 = vld [vmem:[%s3859_s12 + $0x10] sm:$0xff]  ;;  %v350_v58 = vld [vmem:[%s3859_s12 + $0x28] sm:$0xff]  ;;  %s2514_s29 = sshll.u32 %s4059_s19, 4  ;;  %s2864_s16 = sshll.u32 %s3674_s28, 10  ;;  %s4074_s29 = int_to_ptr.vmem [resolvable:$true] %s2514_s29 }
  0x9a   : > { %857 = vmatpush1.bf16.msra.mxu1 %v3154_v33  ;;  %v352_v59 = vld [vmem:[%s3859_s12 + $0x38] sm:$0xff]  ;;  %v3190_v61 = vld [vmem:[#allocation7 + $0x4] ss:$16 sps:$4 sm:$0xff]   ;;  %v3879_v63 = vpack.c.bf16 %v347_v57, %v345_v55  ;;  %v3188_v2 = vld [vmem:[#allocation7] ss:$16 sps:$4 sm:$0xff]   ;;  %s4080_s22 = scalar_lea.hbm %s4133_s7, %s2864_s16  ;;  %s3526_s30 = scalar_lea.vmem %s4074_s29, 1024 }
  0x9b   : > { %858 = vmatprep.subr.bf16.mxu1 %v3155_v34  ;;  %v3173_v62 = vld [vmem:[#allocation5 + $0x16c] ss:$16 sps:$4 sm:$0xff]   ;;  %v3881_v0 = vpack.c.bf16 %v352_v59, %v350_v58  ;;  %v3175_v1 = vld [vmem:[#allocation5 + $0x168] ss:$16 sps:$4 sm:$0xff]   ;;  %v3196_v3 = vld [vmem:[#allocation7 + $0x24] ss:$16 sps:$4 sm:$0xff]   ;;  %p3527_p10 = scmp.ne.s32.totalorder %s4074_s29, %s3526_s30 }
  0x9c   : > { %786 = vmatpush1.bf16.msra.mxu0 %v3109_v11  ;;  %v349_v4 = vld [vmem:[%s3859_s12 + $0x20] sm:$0xff]  ;;  %v351_v5 = vld [vmem:[%s3859_s12 + $0x30] sm:$0xff]  ;;  %v3176_v6 = vld [vmem:[#allocation5 + $0x18c] ss:$16 sps:$4 sm:$0xff]   ;;  %s3610_s28 = smov [#allocation10]  }
  0x9d   : > { %787 = vmatprep.subr.bf16.mxu0 %v3110_v12  ;;  %v354_v7 = vld [vmem:[%s3859_s12 + $0x48] sm:$0xff]  ;;  %v356_v8 = vld [vmem:[%s3859_s12 + $0x58] sm:$0xff]  ;;  %v3194_v10 = vld [vmem:[#allocation7 + $0x20] ss:$16 sps:$4 sm:$0xff]   ;;  %v3889_v13 = vpack.c.bf16 %v351_v5, %v349_v4  ;;  %p3528_p3 = pnand %p3527_p10, %p3804_p5  ;;  %s3530_s9 = sshll.u32 %s3610_s28, 4  ;;  %s3531_s9 = int_to_ptr.vmem [resolvable:$false] %s3530_s9 }
  0x9e   : > { %859 = vmatpush1.bf16.msra.mxu1 %v3157_v37  ;;  %v3178_v9 = vld [vmem:[#allocation5 + $0x188] ss:$16 sps:$4 sm:$0xff]   ;;  %v3202_v11 = vld [vmem:[#allocation7 + $0x44] ss:$16 sps:$4 sm:$0xff]   ;;  %v3179_v12 = vld [vmem:[#allocation5 + $0x1ac] ss:$16 sps:$4 sm:$0xff]   ;;  %v3891_v14 = vpack.c.bf16 %v356_v8, %v354_v7  ;;  %p3533_p12 = scmp.lt.s32.totalorder %s4074_s29, %s3531_s9 }
  0x9f   : > { %860 = vmatprep.subr.bf16.mxu1 %v3158_v38  ;;  %v3181_v15 = vld [vmem:[#allocation5 + $0x1a8] ss:$16 sps:$4 sm:$0xff]   ;;  %v353_v18 = vld [vmem:[%s3859_s12 + $0x40] sm:$0xff]  ;;  %v355_v19 = vld [vmem:[%s3859_s12 + $0x50] sm:$0xff]  ;;  %p3529_p7 = pneg %p3528_p3  ;;  %s3532_s13 = scalar_lea.vmem %s3531_s9, 2048 }
  0xa0   : > { %788 = vmatpush1.bf16.msra.mxu0 %v3112_v16  ;;  %v3200_v16 = vld [vmem:[#allocation7 + $0x40] ss:$16 sps:$4 sm:$0xff]   ;;  %v3182_v20 = vld [vmem:[#allocation5 + $0x1cc] ss:$16 sps:$4 sm:$0xff]   ;;  %v3214_v25 = vld [vmem:[#allocation7 + $0x84] ss:$16 sps:$4 sm:$0xff]   ;;  %p3534_p1 = scmp.lt.s32.totalorder %s3532_s13, %s3526_s30 }
  0xa1   : > { %789 = vmatprep.subr.bf16.mxu0 %v3113_v17  ;;  %v3208_v17 = vld [vmem:[#allocation7 + $0x64] ss:$16 sps:$4 sm:$0xff]   ;;  %v358_v21 = vld [vmem:[%s3859_s12 + $0x68] sm:$0xff]  ;;  %v360_v22 = vld [vmem:[%s3859_s12 + $0x78] sm:$0xff] }
  0xa2   : > { %861 = vmatpush1.bf16.msra.mxu1 %v3160_v41  ;;  %v3185_v26 = vld [vmem:[#allocation5 + $0x1ec] ss:$16 sps:$4 sm:$0xff]   ;;  %v3187_v29 = vld [vmem:[#allocation5 + $0x1e8] ss:$16 sps:$4 sm:$0xff]   ;;  %v3212_v30 = vld [vmem:[#allocation7 + $0x80] ss:$16 sps:$4 sm:$0xff]   ;;  %p3535_p2 = por %p3534_p1, %p3533_p12 }
  0xa3   : > { %862 = vmatprep.subr.bf16.mxu1 %v3161_v42  ;;  %v357_v33 = vld [vmem:[%s3859_s12 + $0x60] sm:$0xff]  ;;  %v359_v34 = vld [vmem:[%s3859_s12 + $0x70] sm:$0xff]  ;;  %v3199_v37 = vld [vmem:[#allocation7 + $0x2c] ss:$16 sps:$4 sm:$0xff]   ;;  %s2501_s12 = scalar_lea.sflag [#allocation4], %s3855_s20 }
  0xa4   : > { %790 = vmatpush1.bf16.msra.mxu0 %v3115_v23  ;;  %v3184_v23 = vld [vmem:[#allocation5 + $0x1c8] ss:$16 sps:$4 sm:$0xff]   ;;  %v3224_v38 = vld [vmem:[#allocation7 + $0xc0] ss:$16 sps:$4 sm:$0xff]   ;;  %v3232_v42 = vld [vmem:[#allocation7 + $0xe4] ss:$16 sps:$4 sm:$0xff]   ;;  %p3536_p4 = pnand %p3535_p2, %p3529_p7 }
  0xa5   : > { %791 = vmatprep.subr.bf16.mxu0 %v3116_v24  ;;  %v3206_v24 = vld [vmem:[#allocation7 + $0x60] ss:$16 sps:$4 sm:$0xff]   ;;  %v3197_v41 = vld [vmem:[#allocation7 + $0x28] ss:$16 sps:$4 sm:$0xff]   ;;  %v3250_v55 = vld [vmem:[#allocation7 + $0x144] ss:$16 sps:$4 sm:$0xff]  }
  0xa6   : > { %863 = vmatpush1.bf16.msra.mxu1 %v3163_v45  ;;  %v3203_v45 = vld [vmem:[#allocation7 + $0x48] ss:$16 sps:$4 sm:$0xff]   ;;  %v3256_v58 = vld [vmem:[#allocation7 + $0x164] ss:$16 sps:$4 sm:$0xff]   ;;  %v3229_v59 = vld [vmem:[#allocation7 + $0xcc] ss:$16 sps:$4 sm:$0xff]  }
  0xa7   : > { %864 = vmatprep.subr.bf16.mxu1 %v3164_v46  ;;  %v3211_v46 = vld [vmem:[#allocation7 + $0x6c] ss:$16 sps:$4 sm:$0xff]   ;;  %v3221_v57 = vld [vmem:[#allocation7 + $0xa8] ss:$16 sps:$4 sm:$0xff]   ;;  %v3266_v4 = vld [vmem:[#allocation7 + $0x1a0] ss:$16 sps:$4 sm:$0xff]  }
  0xa8   : > { %792 = vmatpush1.bf16.msra.mxu0 %v3118_v27  ;;  %v365_v27 = vpack.c.bf16 %v355_v19, %v353_v18  ;;  %v3239_v5 = vld [vmem:[#allocation7 + $0x108] ss:$16 sps:$4 sm:$0xff]   ;;  %v3253_v8 = vld [vmem:[#allocation7 + $0x14c] ss:$16 sps:$4 sm:$0xff]   ;;  %v3272_v18 = vld [vmem:[#allocation7 + $0x1c0] ss:$16 sps:$4 sm:$0xff]  }
  0xa9   : > { %793 = vmatprep.subr.bf16.mxu0 %v3119_v28  ;;  %v3899_v28 = vpack.c.bf16 %v360_v22, %v358_v21  ;;  %v3245_v7 = vld [vmem:[#allocation7 + $0x128] ss:$16 sps:$4 sm:$0xff]   ;;  %v3283_v21 = vld [vmem:[#allocation7 + $0x1ec] ss:$16 sps:$4 sm:$0xff]   ;;  %v3278_v22 = vld [vmem:[#allocation7 + $0x1e0] ss:$16 sps:$4 sm:$0xff]  }
  0xaa   : > { %865 = vmatpush1.bf16.msra.mxu1 %v3166_v49  ;;  %v3209_v49 = vld [vmem:[#allocation7 + $0x68] ss:$16 sps:$4 sm:$0xff]  }
  0xab   : > { %866 = vmatprep.subr.bf16.mxu1 %v3167_v50  ;;  %v3244_v50 = vld [vmem:[#allocation7 + $0x124] ss:$16 sps:$4 sm:$0xff]   ;;  %v3275_v19 = vld [vmem:[#allocation7 + $0x1c8] ss:$16 sps:$4 sm:$0xff]  }
  0xac   : > { %794 = vmatpush1.bf16.msra.mxu0 %v3121_v31  ;;  %v3220_v31 = vld [vmem:[#allocation7 + $0xa4] ss:$16 sps:$4 sm:$0xff]  }
  0xad   : > { %795 = vmatprep.subr.bf16.mxu0 %v3122_v32  ;;  %v3193_v32 = vld [vmem:[#allocation7 + $0xc] ss:$16 sps:$4 sm:$0xff]  }
  0xae   : > { %867 = vmatpush1.bf16.msra.mxu1 %v3169_v53  ;;  %v3215_v53 = vld [vmem:[#allocation7 + $0x88] ss:$16 sps:$4 sm:$0xff]  }
  0xaf   : > { %868 = vmatprep.subr.bf16.mxu1 %v3170_v56  ;;  %v3248_v56 = vld [vmem:[#allocation7 + $0x140] ss:$16 sps:$4 sm:$0xff]  }
  0xb0   : > { %796 = vmatpush1.bf16.msra.mxu0 %v3124_v35  ;;  %v3191_v35 = vld [vmem:[#allocation7 + $0x8] ss:$16 sps:$4 sm:$0xff]  }
  0xb1   : > { %797 = vmatprep.subr.bf16.mxu0 %v3125_v36  ;;  %v3218_v36 = vld [vmem:[#allocation7 + $0xa0] ss:$16 sps:$4 sm:$0xff]  }
  0xb2   : > { %869 = vmatpush1.bf16.msra.mxu1 %v3172_v60  ;;  %v3254_v60 = vld [vmem:[#allocation7 + $0x160] ss:$16 sps:$4 sm:$0xff]  }
  0xb3   : > { %870 = vmatprep.subr.bf16.mxu1 %v3173_v62  ;;  %v3262_v62 = vld [vmem:[#allocation7 + $0x184] ss:$16 sps:$4 sm:$0xff]  }
  0xb4   : > { %798 = vmatpush1.bf16.msra.mxu0 %v3127_v39  ;;  %v3226_v39 = vld [vmem:[#allocation7 + $0xc4] ss:$16 sps:$4 sm:$0xff]  }
  0xb5   : > { %799 = vmatprep.subr.bf16.mxu0 %v3128_v40  ;;  %v367_v40 = vpack.c.bf16 %v359_v34, %v357_v33 }
  0xb6   : > { %871 = vmatpush1.bf16.msra.mxu1 %v3175_v1  ;;  %v3233_v1 = vld [vmem:[#allocation7 + $0xe8] ss:$16 sps:$4 sm:$0xff]  }
  0xb7   : > { %872 = vmatprep.subr.bf16.mxu1 %v3176_v6  ;;  %v3247_v6 = vld [vmem:[#allocation7 + $0x12c] ss:$16 sps:$4 sm:$0xff]  }
  0xb8   : > { %800 = vmatpush1.bf16.msra.mxu0 %v3130_v43  ;;  %v3205_v43 = vld [vmem:[#allocation7 + $0x4c] ss:$16 sps:$4 sm:$0xff]  }
  0xb9   : > { %801 = vmatprep.subr.bf16.mxu0 %v3131_v44  ;;  %v3230_v44 = vld [vmem:[#allocation7 + $0xe0] ss:$16 sps:$4 sm:$0xff]  }
  0xba   : > { %873 = vmatpush1.bf16.msra.mxu1 %v3178_v9  ;;  %v3251_v9 = vld [vmem:[#allocation7 + $0x148] ss:$16 sps:$4 sm:$0xff]  }
  0xbb   : > { %874 = vmatprep.subr.bf16.mxu1 %v3179_v12  ;;  %v3265_v12 = vld [vmem:[#allocation7 + $0x18c] ss:$16 sps:$4 sm:$0xff]  }
  0xbc   : > { %802 = vmatpush1.bf16.msra.mxu0 %v3133_v47  ;;  %v3238_v47 = vld [vmem:[#allocation7 + $0x104] ss:$16 sps:$4 sm:$0xff]  }
  0xbd   : > { %803 = vmatprep.subr.bf16.mxu0 %v3134_v48  ;;  %v3236_v48 = vld [vmem:[#allocation7 + $0x100] ss:$16 sps:$4 sm:$0xff]  }
  0xbe   : > { %875 = vmatpush1.bf16.msra.mxu1 %v3181_v15  ;;  %v3269_v15 = vld [vmem:[#allocation7 + $0x1a8] ss:$16 sps:$4 sm:$0xff]  }
  0xbf   : > { %876 = vmatprep.subr.bf16.mxu1 %v3182_v20  ;;  %v3280_v20 = vld [vmem:[#allocation7 + $0x1e4] ss:$16 sps:$4 sm:$0xff]  }
  0xc0   : > { %804 = vmatpush1.bf16.msra.mxu0 %v3136_v51  ;;  %v3217_v51 = vld [vmem:[#allocation7 + $0x8c] ss:$16 sps:$4 sm:$0xff]  }
  0xc1   : > { %805 = vmatprep.subr.bf16.mxu0 %v3137_v52  ;;  %v3242_v52 = vld [vmem:[#allocation7 + $0x120] ss:$16 sps:$4 sm:$0xff]  }
  0xc2   : > { %877 = vmatpush1.bf16.msra.mxu1 %v3184_v23  ;;  %v3281_v23 = vld [vmem:[#allocation7 + $0x1e8] ss:$16 sps:$4 sm:$0xff]  }
  0xc3   : > { %878 = vmatprep.subr.bf16.mxu1 %v3185_v26  ;;  %v435_v26 = vlaneseq }
  0xc4   : > { %806 = vmatpush1.bf16.msra.mxu0 %v3141_v54  ;;  %v3223_v54 = vld [vmem:[#allocation7 + $0xac] ss:$16 sps:$4 sm:$0xff]  }
  0xc5   : > { %1759 = vmatprep.subr.bf16.mxu0 %v3190_v61  ;;  %v3227_v61 = vld [vmem:[#allocation7 + $0xc8] ss:$16 sps:$4 sm:$0xff]  }
  0xc6   : > { %879 = vmatpush1.bf16.msra.mxu1 %v3187_v29  ;;  %v3915_v29 = vld [vmem:[%s4128_s2] sm:$0xf] }
  0xc7   : > { %808 = vmatmul.mubr.bf16.vlgmr.msra.gmra.mrb[0].mxu0 %v3879_v63  ;;  %1905 = vmatprep.subr.bf16.mxu1 %v3193_v32 }
  0xc8   : > { %817 = vmatprep.mubr.bf16.mxu0 %v3881_v0  ;;  %1760 = vmatpush1.bf16.msra.mxu0 %v3188_v2  ;;  %v3268_v2 = vld [vmem:[#allocation7 + $0x1a4] ss:$16 sps:$4 sm:$0xff]  }
  0xc9   : > { %1761 = vmatprep.subr.bf16.mxu0 %v3196_v3  ;;  %881 = vmatmul.mubr.bf16.vlgmr.msra.gmra.mrb[0].mxu1 %v3879_v63  ;;  %v3235_v63 = vld [vmem:[#allocation7 + $0xec] ss:$16 sps:$4 sm:$0xff]  }
  0xca   : > { %890 = vmatprep.mubr.bf16.mxu1 %v3881_v0  ;;  %1906 = vmatpush1.bf16.msra.mxu1 %v3191_v35  ;;  %v3260_v0 = vld [vmem:[#allocation7 + $0x180] ss:$16 sps:$4 sm:$0xff]   ;;  %v3241_v3 = vld [vmem:[#allocation7 + $0x10c] ss:$16 sps:$4 sm:$0xff]  }
  0xcb   : > { %1907 = vmatprep.subr.bf16.mxu1 %v3199_v37 }
  0xcc   : > { %1762 = vmatpush1.bf16.msra.mxu0 %v3194_v10  ;;  %v3259_v10 = vld [vmem:[#allocation7 + $0x16c] ss:$16 sps:$4 sm:$0xff]  }
  0xcd   : > { %1763 = vmatprep.subr.bf16.mxu0 %v3202_v11  ;;  %v3257_v11 = vld [vmem:[#allocation7 + $0x168] ss:$16 sps:$4 sm:$0xff]  }
  0xce   : > { %1908 = vmatpush1.bf16.msra.mxu1 %v3197_v41 }
  0xcf   : > { %818 = vmatmul.mubr.bf16.gmra.mrb[4].mxu0 %v3889_v13  ;;  %1909 = vmatprep.subr.bf16.mxu1 %v3205_v43 }
  0xd0   : > { %827 = vmatprep.mubr.bf16.mxu0 %v3891_v14  ;;  %1764 = vmatpush1.bf16.msra.mxu0 %v3200_v16  ;;  %v3274_v16 = vld [vmem:[#allocation7 + $0x1c4] ss:$16 sps:$4 sm:$0xff]  }
  0xd1   : > { %1765 = vmatprep.subr.bf16.mxu0 %v3208_v17  ;;  %891 = vmatmul.mubr.bf16.gmra.mrb[4].mxu1 %v3889_v13  ;;  %v3263_v13 = vld [vmem:[#allocation7 + $0x188] ss:$16 sps:$4 sm:$0xff]   ;;  %v3277_v17 = vld [vmem:[#allocation7 + $0x1cc] ss:$16 sps:$4 sm:$0xff]  }
  0xd2   : > { %900 = vmatprep.mubr.bf16.mxu1 %v3891_v14  ;;  %1910 = vmatpush1.bf16.msra.mxu1 %v3203_v45  ;;  %v3271_v14 = vld [vmem:[#allocation7 + $0x1ac] ss:$16 sps:$4 sm:$0xff]  }
  0xd3   : > { %1911 = vmatprep.subr.bf16.mxu1 %v3211_v46 }
  0xd4   : > { %1766 = vmatpush1.bf16.msra.mxu0 %v3206_v24  ;;  %v3286_v24 = vld [vmem:[#allocation7 + $0x204] ss:$16 sps:$4 sm:$0xff]  }
  0xd5   : > { %1767 = vmatprep.subr.bf16.mxu0 %v3214_v25  ;;  %v3289_v25 = vld [vmem:[#allocation7 + $0x20c] ss:$16 sps:$4 sm:$0xff]  }
  0xd6   : > { %1912 = vmatpush1.bf16.msra.mxu1 %v3209_v49 }
  0xd7   : > { %828 = vmatmul.mubr.bf16.gmra.mrb[8].mxu0 %v365_v27  ;;  %1913 = vmatprep.subr.bf16.mxu1 %v3217_v51  ;;  %v3295_v51 = vld [vmem:[#allocation7 + $0x22c] ss:$16 sps:$4 sm:$0xff]  }
  0xd8   : > { %837 = vmatprep.mubr.bf16.mxu0 %v3899_v28  ;;  %1768 = vmatpush1.bf16.msra.mxu0 %v3212_v30 }
  0xd9   : > { %1769 = vmatprep.subr.bf16.mxu0 %v3220_v31  ;;  %901 = vmatmul.mubr.bf16.gmra.mrb[8].mxu1 %v365_v27  ;;  %v3909_v27 = vshrl.u32 %v435_v26, 7  ;;  %v3313_v26 = vld [vmem:[#allocation7 + $0x28c] ss:$16 sps:$4 sm:$0xff]  }
  0xda   : > { %910 = vmatprep.mubr.bf16.mxu1 %v3899_v28  ;;  %1914 = vmatpush1.bf16.msra.mxu1 %v3215_v53 }
  0xdb   : > { %1915 = vmatprep.subr.bf16.mxu1 %v3223_v54  ;;  %v437_v28 = vsub.s32 0, %v3909_v27  ;;  %v441_v30 = vsub.s32 1, %v3909_v27 }
  0xdc   : > { %1770 = vmatpush1.bf16.msra.mxu0 %v3218_v36 }
  0xdd   : > { %1771 = vmatprep.subr.bf16.mxu0 %v3226_v39  ;;  %v3921_v31 = vrot.slane %v3915_v29, %v437_v28  ;;  %v3926_v32 = vrot.slane %v3915_v29, %v441_v30 }
  0xde   : > { %1916 = vmatpush1.bf16.msra.mxu1 %v3221_v57 }
  0xdf   : > { %838 = vmatmul.mubr.bf16.gmra.mrb[12].mxu0 %v367_v40  ;;  %1917 = vmatprep.subr.bf16.mxu1 %v3229_v59  ;;  %v3290_v59 = vld [vmem:[#allocation7 + $0x220] ss:$16 sps:$4 sm:$0xff]  }
  0xe0   : > { %1772 = vmatpush1.bf16.msra.mxu0 %v3224_v38 }
  0xe1   : > { %1773 = vmatprep.subr.bf16.mxu0 %v3232_v42  ;;  %911 = vmatmul.mubr.bf16.gmra.mrb[12].mxu1 %v367_v40 }
  0xe2   : > { %1918 = vmatpush1.bf16.msra.mxu1 %v3227_v61 }
  0xe3   : > { %1919 = vmatprep.subr.bf16.mxu1 %v3235_v63  ;;  %v3298_v63 = vld [vmem:[#allocation7 + $0x244] ss:$16 sps:$4 sm:$0xff]  }
  0xe4   : > { %1774 = vmatpush1.bf16.msra.mxu0 %v3230_v44 }
  0xe5   : > { %1775 = vmatprep.subr.bf16.mxu0 %v3238_v47  ;;  %v3284_v47 = vld [vmem:[#allocation7 + $0x200] ss:$16 sps:$4 sm:$0xff]  }
  0xe6   : > { %1920 = vmatpush1.bf16.msra.mxu1 %v3233_v1 }
  0xe7   : > { %1921 = vmatprep.subr.bf16.mxu1 %v3241_v3  ;;  %v445_v3 = vsub.s32 2, %v3909_v27 }
  0xe8   : > { %1776 = vmatpush1.bf16.msra.mxu0 %v3236_v48  ;;  %v3287_v48 = vld [vmem:[#allocation7 + $0x208] ss:$16 sps:$4 sm:$0xff]  }
  0xe9   : > { %1777 = vmatprep.subr.bf16.mxu0 %v3244_v50  ;;  %v3292_v50 = vld [vmem:[#allocation7 + $0x224] ss:$16 sps:$4 sm:$0xff]  }
  0xea   : > { %1922 = vmatpush1.bf16.msra.mxu1 %v3239_v5  ;;  %v449_v5 = vsub.s32 3, %v3909_v27 }
  0xeb   : > { %1923 = vmatprep.subr.bf16.mxu1 %v3247_v6  ;;  %v3296_v6 = vld [vmem:[#allocation7 + $0x240] ss:$16 sps:$4 sm:$0xff]  }
  0xec   : > { %1778 = vmatpush1.bf16.msra.mxu0 %v3242_v52 }
  0xed   : > { %1779 = vmatprep.subr.bf16.mxu0 %v3250_v55 }
  0xee   : > { %1924 = vmatpush1.bf16.msra.mxu1 %v3245_v7  ;;  %v3299_v7 = vld [vmem:[#allocation7 + $0x248] ss:$16 sps:$4 sm:$0xff]  }
  0xef   : > { %1925 = vmatprep.subr.bf16.mxu1 %v3253_v8 }
  0xf0   : > { %1780 = vmatpush1.bf16.msra.mxu0 %v3248_v56 }
  0xf1   : > { %1781 = vmatprep.subr.bf16.mxu0 %v3256_v58 }
  0xf2   : > { %1926 = vmatpush1.bf16.msra.mxu1 %v3251_v9 }
  0xf3   : > { %1927 = vmatprep.subr.bf16.mxu1 %v3259_v10  ;;  %v3304_v10 = vld [vmem:[#allocation7 + $0x264] ss:$16 sps:$4 sm:$0xff]  }
  0xf4   : > { %1782 = vmatpush1.bf16.msra.mxu0 %v3254_v60  ;;  %v3293_v60 = vld [vmem:[#allocation7 + $0x228] ss:$16 sps:$4 sm:$0xff]  }
  0xf5   : > { %1783 = vmatprep.subr.bf16.mxu0 %v3262_v62 }
  0xf6   : > { %1928 = vmatpush1.bf16.msra.mxu1 %v3257_v11  ;;  %v3307_v11 = vld [vmem:[#allocation7 + $0x26c] ss:$16 sps:$4 sm:$0xff]  }
  0xf7   : > { %1929 = vmatprep.subr.bf16.mxu1 %v3265_v12 }
  0xf8   : > { %1784 = vmatpush1.bf16.msra.mxu0 %v3260_v0  ;;  %v3301_v0 = vld [vmem:[#allocation7 + $0x24c] ss:$16 sps:$4 sm:$0xff]  }
  0xf9   : > { %1785 = vmatprep.subr.bf16.mxu0 %v3268_v2 }
  0xfa   : > { %1930 = vmatpush1.bf16.msra.mxu1 %v3263_v13 }
  0xfb   : > { %1931 = vmatprep.subr.bf16.mxu1 %v3271_v14 }
  0xfc   : > { %1786 = vmatpush1.bf16.msra.mxu0 %v3266_v4 }
  0xfd   : > { %1787 = vmatprep.subr.bf16.mxu0 %v3274_v16  ;;  %v3943_v16 = vrot.slane %v3915_v29, %v445_v3 }
  0xfe   : > { %1932 = vmatpush1.bf16.msra.mxu1 %v3269_v15 }
  0xff   : > { %1933 = vmatprep.subr.bf16.mxu1 %v3277_v17 }
 0x100   : > { %1788 = vmatpush1.bf16.msra.mxu0 %v3272_v18 }
 0x101   : > { %1789 = vmatprep.subr.bf16.mxu0 %v3280_v20  ;;  %v3949_v20 = vrot.slane %v3915_v29, %v449_v5 }
 0x102   : > { %1934 = vmatpush1.bf16.msra.mxu1 %v3275_v19 }
 0x103   : > { %1935 = vmatprep.subr.bf16.mxu1 %v3283_v21  ;;  %v3302_v21 = vld [vmem:[#allocation7 + $0x260] ss:$16 sps:$4 sm:$0xff]  }
 0x104   : > { %1790 = vmatpush1.bf16.msra.mxu0 %v3278_v22  ;;  %v3305_v22 = vld [vmem:[#allocation7 + $0x268] ss:$16 sps:$4 sm:$0xff]  }
 0x105   : > { %1832 = vmatprep.subr.bf16.mxu0 %v3286_v24 }
 0x106   : > { %1936 = vmatpush1.bf16.msra.mxu1 %v3281_v23 }
 0x107   : > { %1978 = vmatprep.subr.bf16.mxu1 %v3289_v25  ;;  %v3310_v25 = vld [vmem:[#allocation7 + $0x284] ss:$16 sps:$4 sm:$0xff]  }
 0x19a   : > { %v809_v33 = vpop.f32.mrb[0].mxu0 }
 0x19b   : > { %v810_v34 = vadd.f32 %v809_v33, %v3921_v31  ;;  %v811_v35 = vpop.f32.mrb[1].mxu0 }
 0x19c   : > { %v812_v36 = vadd.f32 %v811_v35, %v3926_v32  ;;  %v813_v37 = vpop.f32.mrb[2].mxu0 }
 0x19d   : > { %v814_v38 = vadd.f32 %v813_v37, %v3921_v31  ;;  %v815_v39 = vpop.f32.mrb[3].mxu0  ;;  %v921_v41 = vmax.f32 %v810_v34, 0.0  ;;  %v882_v34 = vpop.f32.mrb[0].mxu1 }
 0x19e   : > { %v816_v40 = vadd.f32 %v815_v39, %v3926_v32  ;;  %v922_v43 = vmax.f32 %v812_v36, 0.0  ;;  %v883_v36 = vadd.f32 %v882_v34, %v3943_v16  ;;  %v884_v37 = vpop.f32.mrb[1].mxu1 }
 0x19f   : > { %v925_v42 = vmax.f32 %v814_v38, 0.0  ;;  %v3308_v38 = vld [vmem:[#allocation7 + $0x280] ss:$16 sps:$4 sm:$0xff]   ;;  %v885_v39 = vadd.f32 %v884_v37, %v3949_v20 }
 0x1a0   : > { %v926_v44 = vmax.f32 %v816_v40, 0.0  ;;  %v886_v40 = vpop.f32.mrb[2].mxu1 }
 0x1a1   : > { %v953_v45 = vpack.c.bf16 %v925_v42, %v921_v41  ;;  %v3311_v41 = vld [vmem:[#allocation7 + $0x288] ss:$16 sps:$4 sm:$0xff]  }
 0x1a2   : > { %v954_v46 = vpack.c.bf16 %v926_v44, %v922_v43  ;;  %v819_v49 = vpop.f32.mrb[4].mxu0  ;;  %v923_v44 = vmax.f32 %v883_v36, 0.0  ;;  %v3337_v36 = vld [vmem:[#allocation7 + $0x30c] ss:$16 sps:$4 sm:$0xff]  }
 0x1a3   : > { %v820_v52 = vadd.f32 %v819_v49, %v3921_v31  ;;  %v821_v53 = vpop.f32.mrb[5].mxu0 }
 0x1a4   : > { %1791 = vmatprep.mubr.bf16.mxu0 %v954_v46  ;;  %1937 = vmatprep.mubr.bf16.mxu1 %v954_v46  ;;  %v822_v54 = vadd.f32 %v821_v53, %v3926_v32  ;;  %v823_v55 = vpop.f32.mrb[6].mxu0  ;;  %v888_v46 = vpop.f32.mrb[3].mxu1 }
 0x1a5   : > { %1792 = vmatmul.mubr.bf16.vlgmr.msra.gmra.mrb[16].mxu0 %v953_v45  ;;  %1938 = vmatmul.mubr.bf16.vlgmr.msra.gmra.mrb[16].mxu1 %v953_v45  ;;  %v929_v56 = vmax.f32 %v820_v52, 0.0  ;;  %v824_v57 = vadd.f32 %v823_v55, %v3921_v31  ;;  %v825_v58 = vpop.f32.mrb[7].mxu0  ;;  %v887_v45 = vadd.f32 %v886_v40, %v3943_v16  ;;  %v889_v52 = vadd.f32 %v888_v46, %v3949_v20 }
 0x1a6   : > { %1833 = vmatpush1.bf16.msra.mxu0 %v3284_v47  ;;  %1979 = vmatpush1.bf16.msra.mxu1 %v3287_v48  ;;  %v930_v61 = vmax.f32 %v822_v54, 0.0  ;;  %v826_v62 = vadd.f32 %v825_v58, %v3926_v32  ;;  %v3316_v47 = vld [vmem:[#allocation7 + $0x2a4] ss:$16 sps:$4 sm:$0xff]   ;;  %v3319_v48 = vld [vmem:[#allocation7 + $0x2ac] ss:$16 sps:$4 sm:$0xff]  }
 0x1a7   : > { %1834 = vmatprep.subr.bf16.mxu0 %v3292_v50  ;;  %1980 = vmatprep.subr.bf16.mxu1 %v3295_v51  ;;  %v933_v1 = vmax.f32 %v824_v57, 0.0  ;;  %v924_v51 = vmax.f32 %v885_v39, 0.0  ;;  %v927_v55 = vmax.f32 %v887_v45, 0.0 }
 0x1a8   : > { %v934_v2 = vmax.f32 %v826_v62, 0.0 }
 0x1a9   : > { %v957_v4 = vpack.c.bf16 %v933_v1, %v929_v56  ;;  %v3322_v1 = vld [vmem:[#allocation7 + $0x2c4] ss:$16 sps:$4 sm:$0xff]  }
 0x1aa   : > { %1835 = vmatpush1.bf16.msra.mxu0 %v3290_v59  ;;  %1981 = vmatpush1.bf16.msra.mxu1 %v3293_v60  ;;  %v958_v8 = vpack.c.bf16 %v934_v2, %v930_v61  ;;  %v829_v9 = vpop.f32.mrb[8].mxu0  ;;  %v928_v59 = vmax.f32 %v889_v52, 0.0  ;;  %v3314_v60 = vld [vmem:[#allocation7 + $0x2a0] ss:$16 sps:$4 sm:$0xff]   ;;  %v3317_v61 = vld [vmem:[#allocation7 + $0x2a8] ss:$16 sps:$4 sm:$0xff]  }
 0x1ab   : > { %1836 = vmatprep.subr.bf16.mxu0 %v3298_v63  ;;  %1982 = vmatprep.subr.bf16.mxu1 %v3301_v0  ;;  %v830_v12 = vadd.f32 %v829_v9, %v3921_v31  ;;  %v831_v13 = vpop.f32.mrb[9].mxu0  ;;  %v3960_v0 = vpack.c.bf16 %v927_v55, %v923_v44  ;;  %v3325_v2 = vld [vmem:[#allocation7 + $0x2cc] ss:$16 sps:$4 sm:$0xff]  }
 0x1ac   : > { %v832_v14 = vadd.f32 %v831_v13, %v3926_v32  ;;  %v833_v15 = vpop.f32.mrb[10].mxu0  ;;  %1801 = vmatprep.mubr.bf16.mxu0 %v958_v8  ;;  %1947 = vmatprep.mubr.bf16.mxu1 %v958_v8  ;;  %v3323_v13 = vld [vmem:[#allocation7 + $0x2c8] ss:$16 sps:$4 sm:$0xff]  }
 0x1ad   : > { %v937_v17 = vmax.f32 %v830_v12, 0.0  ;;  %v834_v18 = vadd.f32 %v833_v15, %v3921_v31  ;;  %v835_v19 = vpop.f32.mrb[11].mxu0  ;;  %1802 = vmatmul.mubr.bf16.gmra.mrb[20].mxu0 %v957_v4  ;;  %1948 = vmatmul.mubr.bf16.gmra.mrb[20].mxu1 %v957_v4 }
 0x1ae   : > { %1837 = vmatpush1.bf16.msra.mxu0 %v3296_v6  ;;  %1983 = vmatpush1.bf16.msra.mxu1 %v3299_v7  ;;  %v938_v23 = vmax.f32 %v832_v14, 0.0  ;;  %v836_v24 = vadd.f32 %v835_v19, %v3926_v32  ;;  %v956_v6 = vpack.c.bf16 %v928_v59, %v924_v51  ;;  %v3328_v19 = vld [vmem:[#allocation7 + $0x2e4] ss:$16 sps:$4 sm:$0xff]  }
 0x1af   : > { %1838 = vmatprep.subr.bf16.mxu0 %v3304_v10  ;;  %1984 = vmatprep.subr.bf16.mxu1 %v3307_v11  ;;  %v941_v33 = vmax.f32 %v834_v18, 0.0 }
 0x1b0   : > { %v942_v35 = vmax.f32 %v836_v24, 0.0 }
 0x1b1   : > { %v961_v29 = vpack.c.bf16 %v941_v33, %v937_v17  ;;  %v3329_v33 = vld [vmem:[#allocation7 + $0x2e8] ss:$16 sps:$4 sm:$0xff]  }
 0x1b2   : > { %1839 = vmatpush1.bf16.msra.mxu0 %v3302_v21  ;;  %1985 = vmatpush1.bf16.msra.mxu1 %v3305_v22  ;;  %v962_v42 = vpack.c.bf16 %v942_v35, %v938_v23  ;;  %v839_v43 = vpop.f32.mrb[12].mxu0  ;;  %v3331_v21 = vld [vmem:[#allocation7 + $0x2ec] ss:$16 sps:$4 sm:$0xff]   ;;  %v3334_v35 = vld [vmem:[#allocation7 + $0x304] ss:$16 sps:$4 sm:$0xff]  }
 0x1b3   : > { %1840 = vmatprep.subr.bf16.mxu0 %v3310_v25  ;;  %1986 = vmatprep.subr.bf16.mxu1 %v3313_v26  ;;  %v840_v49 = vadd.f32 %v839_v43, %v3921_v31  ;;  %v841_v50 = vpop.f32.mrb[13].mxu0  ;;  %v3326_v26 = vld [vmem:[#allocation7 + $0x2e0] ss:$16 sps:$4 sm:$0xff]   ;;  %v3335_v43 = vld [vmem:[#allocation7 + $0x308] ss:$16 sps:$4 sm:$0xff]  }
 0x1b4   : > { %v842_v53 = vadd.f32 %v841_v50, %v3926_v32  ;;  %v843_v54 = vpop.f32.mrb[14].mxu0  ;;  %1811 = vmatprep.mubr.bf16.mxu0 %v962_v42  ;;  %1957 = vmatprep.mubr.bf16.mxu1 %v962_v42  ;;  %v3332_v42 = vld [vmem:[#allocation7 + $0x300] ss:$16 sps:$4 sm:$0xff]  }
 0x1b5   : > { %v945_v56 = vmax.f32 %v840_v49, 0.0  ;;  %v844_v57 = vadd.f32 %v843_v54, %v3921_v31  ;;  %v845_v58 = vpop.f32.mrb[15].mxu0  ;;  %1812 = vmatmul.mubr.bf16.gmra.mrb[24].mxu0 %v961_v29  ;;  %1958 = vmatmul.mubr.bf16.gmra.mrb[24].mxu1 %v961_v29  ;;  %v892_v31 = vpop.f32.mrb[4].mxu1  ;;  %v3341_v54 = vld [vmem:[#allocation7 + $0x328] ss:$16 sps:$4 sm:$0xff]  }
 0x1b6   : > { %1841 = vmatpush1.bf16.msra.mxu0 %v3308_v38  ;;  %1987 = vmatpush1.bf16.msra.mxu1 %v3311_v41  ;;  %v946_v62 = vmax.f32 %v842_v53, 0.0  ;;  %v846_v63 = vadd.f32 %v845_v58, %v3926_v32  ;;  %v893_v8 = vadd.f32 %v892_v31, %v3943_v16  ;;  %v894_v9 = vpop.f32.mrb[5].mxu1  ;;  %v3320_v32 = vld [vmem:[#allocation7 + $0x2c0] ss:$16 sps:$4 sm:$0xff]  }
 0x1b7   : > { %1842 = vmatprep.subr.bf16.mxu0 %v3316_v47  ;;  %1988 = vmatprep.subr.bf16.mxu1 %v3319_v48  ;;  %v949_v4 = vmax.f32 %v844_v57, 0.0  ;;  %v895_v11 = vadd.f32 %v894_v9, %v3949_v20  ;;  %v896_v12 = vpop.f32.mrb[6].mxu1  ;;  %v3340_v47 = vld [vmem:[#allocation7 + $0x324] ss:$16 sps:$4 sm:$0xff]   ;;  %v3343_v48 = vld [vmem:[#allocation7 + $0x32c] ss:$16 sps:$4 sm:$0xff]  }
 0x1b8   : > { %v950_v7 = vmax.f32 %v846_v63, 0.0  ;;  %v931_v15 = vmax.f32 %v893_v8, 0.0  ;;  %v897_v17 = vadd.f32 %v896_v12, %v3943_v16  ;;  %v898_v18 = vpop.f32.mrb[7].mxu1  ;;  %v3338_v53 = vld [vmem:[#allocation7 + $0x320] ss:$16 sps:$4 sm:$0xff]  }
 0x1b9   : > { %v965_v10 = vpack.c.bf16 %v949_v4, %v945_v56  ;;  %v932_v22 = vmax.f32 %v895_v11, 0.0  ;;  %v899_v23 = vadd.f32 %v898_v18, %v3949_v20  ;;  %v902_v38 = vpop.f32.mrb[8].mxu1  ;;  %v3346_v56 = vld [vmem:[#allocation7 + $0x344] ss:$16 sps:$4 sm:$0xff]   ;;  %v3349_v57 = vld [vmem:[#allocation7 + $0x34c] ss:$16 sps:$4 sm:$0xff]  }
 0x1ba   : > { %1843 = vmatpush1.bf16.msra.mxu0 %v3314_v60  ;;  %1989 = vmatpush1.bf16.msra.mxu1 %v3317_v61  ;;  %v966_v14 = vpack.c.bf16 %v950_v7, %v946_v62  ;;  %v935_v24 = vmax.f32 %v897_v17, 0.0  ;;  %v903_v29 = vadd.f32 %v902_v38, %v3943_v16  ;;  %v904_v39 = vpop.f32.mrb[9].mxu1  ;;  %v3352_v7 = vld [vmem:[#allocation7 + $0x364] ss:$16 sps:$4 sm:$0xff]   ;;  %v3355_v8 = vld [vmem:[#allocation7 + $0x36c] ss:$16 sps:$4 sm:$0xff]  }
 0x1bb   : > { %1844 = vmatprep.subr.bf16.mxu0 %v3322_v1  ;;  %1990 = vmatprep.subr.bf16.mxu1 %v3325_v2  ;;  %v936_v25 = vmax.f32 %v899_v23, 0.0  ;;  %v905_v40 = vadd.f32 %v904_v39, %v3949_v20  ;;  %v906_v41 = vpop.f32.mrb[10].mxu1  ;;  %v3344_v1 = vld [vmem:[#allocation7 + $0x340] ss:$16 sps:$4 sm:$0xff]   ;;  %v3347_v2 = vld [vmem:[#allocation7 + $0x348] ss:$16 sps:$4 sm:$0xff]  }
 0x1bc   : > { %1821 = vmatprep.mubr.bf16.mxu0 %v966_v14  ;;  %1967 = vmatprep.mubr.bf16.mxu1 %v966_v14  ;;  %v3966_v34 = vpack.c.bf16 %v935_v24, %v931_v15  ;;  %v939_v44 = vmax.f32 %v903_v29, 0.0  ;;  %v907_v45 = vadd.f32 %v906_v41, %v3943_v16  ;;  %v908_v46 = vpop.f32.mrb[11].mxu1  ;;  %v3358_v15 = vld [vmem:[#allocation7 + $0x384] ss:$16 sps:$4 sm:$0xff]   ;;  %v3356_v18 = vld [vmem:[#allocation7 + $0x380] ss:$16 sps:$4 sm:$0xff]  }
 0x1bd   : > { %1822 = vmatmul.mubr.bf16.gmra.mrb[28].mxu0 %v965_v10  ;;  %1968 = vmatmul.mubr.bf16.gmra.mrb[28].mxu1 %v965_v10  ;;  %v3968_v37 = vpack.c.bf16 %v936_v25, %v932_v22  ;;  %v940_v49 = vmax.f32 %v905_v40, 0.0  ;;  %v909_v50 = vadd.f32 %v908_v46, %v3949_v20  ;;  %v912_v59 = vpop.f32.mrb[12].mxu1  ;;  %v3362_v22 = vld [vmem:[#allocation7 + $0x3a0] ss:$16 sps:$4 sm:$0xff]   ;;  %v3365_v23 = vld [vmem:[#allocation7 + $0x3a8] ss:$16 sps:$4 sm:$0xff]  }
 0x1be   : > { %1845 = vmatpush1.bf16.msra.mxu0 %v3320_v32  ;;  %1991 = vmatpush1.bf16.msra.mxu1 %v3323_v13  ;;  %v943_v51 = vmax.f32 %v907_v45, 0.0  ;;  %v913_v60 = vadd.f32 %v912_v59, %v3943_v16  ;;  %v914_v61 = vpop.f32.mrb[13].mxu1  ;;  %v3350_v32 = vld [vmem:[#allocation7 + $0x360] ss:$16 sps:$4 sm:$0xff]   ;;  %v3353_v13 = vld [vmem:[#allocation7 + $0x368] ss:$16 sps:$4 sm:$0xff]  }
 0x1bf   : > { %1846 = vmatprep.subr.bf16.mxu0 %v3328_v19  ;;  %1992 = vmatprep.subr.bf16.mxu1 %v3331_v21  ;;  %v944_v52 = vmax.f32 %v909_v50, 0.0  ;;  %v915_v62 = vadd.f32 %v914_v61, %v3949_v20  ;;  %v916_v63 = vpop.f32.mrb[14].mxu1  ;;  %v3359_v19 = vld [vmem:[#allocation7 + $0x388] ss:$16 sps:$4 sm:$0xff]   ;;  %v3367_v21 = vld [vmem:[#allocation7 + $0x3ac] ss:$16 sps:$4 sm:$0xff]  }
 0x1c0   : > { %1864 = vmatprep.mubr.bf16.mxu0 %v956_v6  ;;  %2010 = vmatprep.mubr.bf16.mxu1 %v956_v6  ;;  %v3974_v55 = vpack.c.bf16 %v943_v51, %v939_v44  ;;  %v947_v4 = vmax.f32 %v913_v60, 0.0  ;;  %v917_v6 = vadd.f32 %v916_v63, %v3943_v16  ;;  %v918_v31 = vpop.f32.mrb[15].mxu1  ;;  %v3361_v16 = vld [vmem:[#allocation7 + $0x38c] ss:$16 sps:$4 sm:$0xff]   ;;  %v3370_v24 = vld [vmem:[#allocation7 + $0x3c4] ss:$16 sps:$4 sm:$0xff]  }
 0x1c1   : > { %v3976_v58 = vpack.c.bf16 %v944_v52, %v940_v49  ;;  %v948_v9 = vmax.f32 %v915_v62, 0.0  ;;  %v919_v10 = vadd.f32 %v918_v31, %v3949_v20  ;;  %v3364_v20 = vld [vmem:[#allocation7 + $0x3a4] ss:$16 sps:$4 sm:$0xff]   ;;  %v3373_v25 = vld [vmem:[#allocation7 + $0x3cc] ss:$16 sps:$4 sm:$0xff]  }
 0x1c2   : > { %1847 = vmatpush1.bf16.msra.mxu0 %v3326_v26  ;;  %1993 = vmatpush1.bf16.msra.mxu1 %v3329_v33  ;;  %v951_v11 = vmax.f32 %v917_v6, 0.0  ;;  %v3368_v26 = vld [vmem:[#allocation7 + $0x3c0] ss:$16 sps:$4 sm:$0xff]   ;;  %v3371_v33 = vld [vmem:[#allocation7 + $0x3c8] ss:$16 sps:$4 sm:$0xff]  }
 0x1c3   : > { %1848 = vmatprep.subr.bf16.mxu0 %v3334_v35  ;;  %1994 = vmatprep.subr.bf16.mxu1 %v3337_v36  ;;  %v952_v12 = vmax.f32 %v919_v10, 0.0  ;;  %v3376_v35 = vld [vmem:[#allocation7 + $0x3e4] ss:$16 sps:$4 sm:$0xff]   ;;  %v3379_v36 = vld [vmem:[#allocation7 + $0x3ec] ss:$16 sps:$4 sm:$0xff]  }
 0x1c4   : > { %v3982_v14 = vpack.c.bf16 %v951_v11, %v947_v4  ;;  %v3374_v38 = vld [vmem:[#allocation7 + $0x3e0] ss:$16 sps:$4 sm:$0xff]   ;;  %v3377_v29 = vld [vmem:[#allocation7 + $0x3e8] ss:$16 sps:$4 sm:$0xff]  }
 0x1c5   : > { %v3984_v17 = vpack.c.bf16 %v952_v12, %v948_v9  ;;  %v3380_v39 = vld [vmem:[#allocation8 + $0x40] sm:$0xff]   ;;  %v3386_v44 = vld [vmem:[#allocation8 + $0xc8] sm:$0xff]   ;;  %v3389_v49 = vld [vmem:[#allocation8 + $0x10] sm:$0xff]  }
 0x1c6   : > { %1849 = vmatpush1.bf16.msra.mxu0 %v3332_v42  ;;  %1995 = vmatpush1.bf16.msra.mxu1 %v3335_v43  ;;  %v3382_v40 = vld [vmem:[#allocation8 + $0xc0] sm:$0xff]   ;;  %v3384_v43 = vld [vmem:[#allocation8 + $0x48] sm:$0xff]   ;;  %v3391_v50 = vld [vmem:[#allocation8 + $0x90] sm:$0xff]  }
 0x1c7   : > { %1850 = vmatprep.subr.bf16.mxu0 %v3340_v47  ;;  %1996 = vmatprep.subr.bf16.mxu1 %v3343_v48  ;;  %v3381_v41 = vld [vmem:[#allocation8] sm:$0xff]   ;;  %v3385_v45 = vld [vmem:[#allocation8 + $0x8] sm:$0xff]   ;;  %v3388_v47 = vld [vmem:[#allocation8 + $0x50] sm:$0xff]  }
 0x1c8   : > { %v3383_v42 = vld [vmem:[#allocation8 + $0x80] sm:$0xff]   ;;  %v3387_v46 = vld [vmem:[#allocation8 + $0x88] sm:$0xff]   ;;  %v3390_v48 = vld [vmem:[#allocation8 + $0xd0] sm:$0xff]  }
 0x1c9   : > { %v3392_v51 = vld [vmem:[#allocation8 + $0x58] sm:$0xff]   ;;  %v3400_v59 = vld [vmem:[#allocation8 + $0x68] sm:$0xff]   ;;  %v3404_v61 = vld [vmem:[#allocation8 + $0x70] sm:$0xff]  }
 0x1ca   : > { %1851 = vmatpush1.bf16.msra.mxu0 %v3338_v53  ;;  %1997 = vmatpush1.bf16.msra.mxu1 %v3341_v54  ;;  %v3395_v52 = vld [vmem:[#allocation8 + $0x98] sm:$0xff]   ;;  %v3396_v53 = vld [vmem:[#allocation8 + $0x60] sm:$0xff]   ;;  %v3403_v60 = vld [vmem:[#allocation8 + $0xa8] sm:$0xff]  }
 0x1cb   : > { %1852 = vmatprep.subr.bf16.mxu0 %v3346_v56  ;;  %1998 = vmatprep.subr.bf16.mxu1 %v3349_v57  ;;  %v3398_v54 = vld [vmem:[#allocation8 + $0xe0] sm:$0xff]   ;;  %v3406_v62 = vld [vmem:[#allocation8 + $0xf0] sm:$0xff]   ;;  %v3409_v4 = vld [vmem:[#allocation8 + $0x38] sm:$0xff]  }
 0x1cc   : > { %v3397_v56 = vld [vmem:[#allocation8 + $0x20] sm:$0xff]   ;;  %v3405_v63 = vld [vmem:[#allocation8 + $0x30] sm:$0xff]   ;;  %v3411_v6 = vld [vmem:[#allocation8 + $0xb8] sm:$0xff]  }
 0x1cd   : > { %v3399_v57 = vld [vmem:[#allocation8 + $0xa0] sm:$0xff]  }
 0x1ce   : > { %1853 = vmatpush1.bf16.msra.mxu0 %v3344_v1  ;;  %1999 = vmatpush1.bf16.msra.mxu1 %v3347_v2  ;;  %v3408_v1 = vld [vmem:[#allocation8 + $0x78] sm:$0xff]   ;;  %v1097_v31 = vld [vmem:[%s4130_s4] sm:$0xf] }
 0x1cf   : > { %1854 = vmatprep.subr.bf16.mxu0 %v3352_v7  ;;  %2000 = vmatprep.subr.bf16.mxu1 %v3355_v8  ;;  %v3410_v2 = vld [vmem:[#allocation8 + $0xf8] sm:$0xff]   ;;  %v4005_v7 = vrot.slane %v1097_v31, %v437_v28  ;;  %v4009_v8 = vrot.slane %v1097_v31, %v445_v3  ;;  %v4013_v9 = vrot.slane %v1097_v31, %v441_v30 }
 0x1d0   : > { %v4017_v10 = vrot.slane %v1097_v31, %v449_v5 }
 0x1d2   : > { %1855 = vmatpush1.bf16.msra.mxu0 %v3350_v32  ;;  %2001 = vmatpush1.bf16.msra.mxu1 %v3353_v13 }
 0x1d3   : > { %1856 = vmatprep.subr.bf16.mxu0 %v3358_v15  ;;  %2002 = vmatprep.subr.bf16.mxu1 %v3361_v16 }
 0x1d6   : > { %1857 = vmatpush1.bf16.msra.mxu0 %v3356_v18  ;;  %2003 = vmatpush1.bf16.msra.mxu1 %v3359_v19 }
 0x1d7   : > { %1858 = vmatprep.subr.bf16.mxu0 %v3364_v20  ;;  %2004 = vmatprep.subr.bf16.mxu1 %v3367_v21 }
 0x1da   : > { %1859 = vmatpush1.bf16.msra.mxu0 %v3362_v22  ;;  %2005 = vmatpush1.bf16.msra.mxu1 %v3365_v23 }
 0x1db   : > { %1860 = vmatprep.subr.bf16.mxu0 %v3370_v24  ;;  %2006 = vmatprep.subr.bf16.mxu1 %v3373_v25 }
 0x1de   : > { %1861 = vmatpush1.bf16.msra.mxu0 %v3368_v26  ;;  %2007 = vmatpush1.bf16.msra.mxu1 %v3371_v33 }
 0x1df   : > { %1862 = vmatprep.subr.bf16.mxu0 %v3376_v35  ;;  %2008 = vmatprep.subr.bf16.mxu1 %v3379_v36 }
 0x1e2   : > { %1863 = vmatpush1.bf16.msra.mxu0 %v3374_v38  ;;  %2009 = vmatpush1.bf16.msra.mxu1 %v3377_v29 }
 0x1e3   : > { %2865 = vmatprep.subr.bf16.mxu0 %v3380_v39  ;;  %2905 = vmatprep.subr.bf16.mxu1 %v3382_v40 }
 0x1e5   : > { %1865 = vmatmul.mubr.bf16.vlgmr.msra.gmra.mrb[16].mxu0 %v3960_v0  ;;  %2011 = vmatmul.mubr.bf16.vlgmr.msra.gmra.mrb[16].mxu1 %v3960_v0  ;;  %v3394_v0 = vld [vmem:[#allocation8 + $0xd8] sm:$0xff]  }
 0x1e6   : > { %1874 = vmatprep.mubr.bf16.mxu0 %v3968_v37  ;;  %2020 = vmatprep.mubr.bf16.mxu1 %v3968_v37  ;;  %v3393_v37 = vld [vmem:[#allocation8 + $0x18] sm:$0xff]  }
 0x1e7   : > { %2866 = vmatpush3.bf16.msra.mxu0 %v3381_v41  ;;  %2906 = vmatpush3.bf16.msra.mxu1 %v3383_v42 }
 0x1e8   : > { %2867 = vmatprep.subr.bf16.mxu0 %v3384_v43  ;;  %2907 = vmatprep.subr.bf16.mxu1 %v3386_v44 }
 0x1eb   : > { %2868 = vmatpush3.bf16.msra.mxu0 %v3385_v45  ;;  %2908 = vmatpush3.bf16.msra.mxu1 %v3387_v46 }
 0x1ec   : > { %2869 = vmatprep.subr.bf16.mxu0 %v3388_v47  ;;  %2909 = vmatprep.subr.bf16.mxu1 %v3390_v48 }
 0x1ed   : > { %1875 = vmatmul.mubr.bf16.gmra.mrb[20].mxu0 %v3966_v34  ;;  %2021 = vmatmul.mubr.bf16.gmra.mrb[20].mxu1 %v3966_v34  ;;  %v3402_v34 = vld [vmem:[#allocation8 + $0xe8] sm:$0xff]  }
 0x1ee   : > { %1884 = vmatprep.mubr.bf16.mxu0 %v3976_v58  ;;  %2030 = vmatprep.mubr.bf16.mxu1 %v3976_v58  ;;  %v3401_v58 = vld [vmem:[#allocation8 + $0x28] sm:$0xff]  }
 0x1ef   : > { %2870 = vmatpush3.bf16.msra.mxu0 %v3389_v49  ;;  %2910 = vmatpush3.bf16.msra.mxu1 %v3391_v50 }
 0x1f0   : > { %2871 = vmatprep.subr.bf16.mxu0 %v3392_v51  ;;  %2911 = vmatprep.subr.bf16.mxu1 %v3394_v0 }
 0x1f3   : > { %2872 = vmatpush3.bf16.msra.mxu0 %v3393_v37  ;;  %2912 = vmatpush3.bf16.msra.mxu1 %v3395_v52 }
 0x1f4   : > { %2873 = vmatprep.subr.bf16.mxu0 %v3396_v53  ;;  %2913 = vmatprep.subr.bf16.mxu1 %v3398_v54 }
 0x1f5   : > { %1885 = vmatmul.mubr.bf16.gmra.mrb[24].mxu0 %v3974_v55  ;;  %2031 = vmatmul.mubr.bf16.gmra.mrb[24].mxu1 %v3974_v55  ;;  %v3407_v55 = vld [vmem:[#allocation8 + $0xb0] sm:$0xff]  }
 0x1f6   : > { %1894 = vmatprep.mubr.bf16.mxu0 %v3984_v17  ;;  %2040 = vmatprep.mubr.bf16.mxu1 %v3984_v17 }
 0x1f7   : > { %2874 = vmatpush3.bf16.msra.mxu0 %v3397_v56  ;;  %2914 = vmatpush3.bf16.msra.mxu1 %v3399_v57 }
 0x1f8   : > { %2875 = vmatprep.subr.bf16.mxu0 %v3400_v59  ;;  %2915 = vmatprep.subr.bf16.mxu1 %v3402_v34 }
 0x1fb   : > { %2876 = vmatpush3.bf16.msra.mxu0 %v3401_v58  ;;  %2916 = vmatpush3.bf16.msra.mxu1 %v3403_v60 }
 0x1fc   : > { %2877 = vmatprep.subr.bf16.mxu0 %v3404_v61  ;;  %2917 = vmatprep.subr.bf16.mxu1 %v3406_v62 }
 0x1fd   : > { %1895 = vmatmul.mubr.bf16.gmra.mrb[28].mxu0 %v3982_v14  ;;  %2041 = vmatmul.mubr.bf16.gmra.mrb[28].mxu1 %v3982_v14 }
 0x1ff   : > { %2878 = vmatpush3.bf16.msra.mxu0 %v3405_v63  ;;  %2918 = vmatpush3.bf16.msra.mxu1 %v3407_v55 }
 0x200   : > { %2879 = vmatprep.subr.bf16.mxu0 %v3408_v1  ;;  %2919 = vmatprep.subr.bf16.mxu1 %v3410_v2 }
 0x203   : > { %2880 = vmatpush3.bf16.msra.mxu0 %v3409_v4  ;;  %2920 = vmatpush3.bf16.msra.mxu1 %v3411_v6 }
 0x2b8   : > { %v1866_v11 = vpop.f32.mrb[16].mxu0  ;;  %v2012_v12 = vpop.f32.mrb[16].mxu1 }
 0x2b9   : > { %v2945_v32 = vadd.f32 %v1866_v11, %v4005_v7  ;;  %v2961_v13 = vadd.f32 %v2012_v12, %v4009_v8  ;;  %v1868_v28 = vpop.f32.mrb[17].mxu0  ;;  %v2014_v14 = vpop.f32.mrb[17].mxu1 }
 0x2ba   : > { %v2946_v15 = vadd.f32 %v1868_v28, %v4013_v9  ;;  %v2962_v3 = vadd.f32 %v2014_v14, %v4017_v10  ;;  %v1870_v16 = vpop.f32.mrb[18].mxu0  ;;  %v2016_v17 = vpop.f32.mrb[18].mxu1 }
 0x2bb   : > { %v2947_v30 = vadd.f32 %v1870_v16, %v4005_v7  ;;  %v2963_v27 = vadd.f32 %v2016_v17, %v4009_v8  ;;  %v1872_v5 = vpop.f32.mrb[19].mxu0  ;;  %v2018_v18 = vpop.f32.mrb[19].mxu1  ;;  %v2051_v21 = vmax.f32 %v2945_v32, 0.0  ;;  %v2053_v22 = vmax.f32 %v2961_v13, 0.0 }
 0x2bc   : > { %v2948_v19 = vadd.f32 %v1872_v5, %v4013_v9  ;;  %v2964_v20 = vadd.f32 %v2018_v18, %v4017_v10  ;;  %v2052_v25 = vmax.f32 %v2946_v15, 0.0  ;;  %v2054_v26 = vmax.f32 %v2962_v3, 0.0 }
 0x2bd   : > { %v2055_v23 = vmax.f32 %v2947_v30, 0.0  ;;  %v2057_v24 = vmax.f32 %v2963_v27, 0.0 }
 0x2be   : > { %v2056_v33 = vmax.f32 %v2948_v19, 0.0  ;;  %v2058_v35 = vmax.f32 %v2964_v20, 0.0 }
 0x2bf   : > { %v2083_v36 = vpack.c.bf16 %v2055_v23, %v2051_v21  ;;  %v2085_v38 = vpack.c.bf16 %v2057_v24, %v2053_v22 }
 0x2c0   : > { %v2084_v29 = vpack.c.bf16 %v2056_v33, %v2052_v25  ;;  %v2086_v39 = vpack.c.bf16 %v2058_v35, %v2054_v26  ;;  %v1876_v40 = vpop.f32.mrb[20].mxu0  ;;  %v2022_v41 = vpop.f32.mrb[20].mxu1 }
 0x2c1   : > { %v2949_v42 = vadd.f32 %v1876_v40, %v4005_v7  ;;  %v2965_v43 = vadd.f32 %v2022_v41, %v4009_v8  ;;  %v1878_v44 = vpop.f32.mrb[21].mxu0  ;;  %v2024_v45 = vpop.f32.mrb[21].mxu1 }
 0x2c2   : > { %v2950_v46 = vadd.f32 %v1878_v44, %v4013_v9  ;;  %v2966_v47 = vadd.f32 %v2024_v45, %v4017_v10  ;;  %v1880_v48 = vpop.f32.mrb[22].mxu0  ;;  %v2026_v49 = vpop.f32.mrb[22].mxu1  ;;  %2394 = vmatprep.mubr.bf16.mxu0 %v2084_v29  ;;  %2459 = vmatprep.mubr.bf16.mxu1 %v2086_v39 }
 0x2c3   : > { %v2951_v50 = vadd.f32 %v1880_v48, %v4005_v7  ;;  %v2967_v51 = vadd.f32 %v2026_v49, %v4009_v8  ;;  %v1882_v0 = vpop.f32.mrb[23].mxu0  ;;  %v2028_v37 = vpop.f32.mrb[23].mxu1  ;;  %2395 = vmatmul.mubr.bf16.vlgmr.msra.gmra.mrb[32].mxu0 %v2083_v36  ;;  %2460 = vmatmul.mubr.bf16.vlgmr.msra.gmra.mrb[32].mxu1 %v2085_v38  ;;  %v2059_v54 = vmax.f32 %v2949_v42, 0.0  ;;  %v2061_v56 = vmax.f32 %v2965_v43, 0.0 }
 0x2c4   : > { %v2952_v52 = vadd.f32 %v1882_v0, %v4013_v9  ;;  %v2968_v53 = vadd.f32 %v2028_v37, %v4017_v10  ;;  %v2060_v34 = vmax.f32 %v2950_v46, 0.0  ;;  %v2062_v58 = vmax.f32 %v2966_v47, 0.0 }
 0x2c5   : > { %v2063_v57 = vmax.f32 %v2951_v50, 0.0  ;;  %v2065_v59 = vmax.f32 %v2967_v51, 0.0 }
 0x2c6   : > { %v2064_v60 = vmax.f32 %v2952_v52, 0.0  ;;  %v2066_v61 = vmax.f32 %v2968_v53, 0.0 }
 0x2c7   : > { %v2087_v62 = vpack.c.bf16 %v2063_v57, %v2059_v54  ;;  %v2089_v63 = vpack.c.bf16 %v2065_v59, %v2061_v56 }
 0x2c8   : > { %v2088_v55 = vpack.c.bf16 %v2064_v60, %v2060_v34  ;;  %v2090_v1 = vpack.c.bf16 %v2066_v61, %v2062_v58  ;;  %v1886_v2 = vpop.f32.mrb[24].mxu0  ;;  %v2032_v4 = vpop.f32.mrb[24].mxu1 }
 0x2c9   : > { %v2953_v6 = vadd.f32 %v1886_v2, %v4005_v7  ;;  %v2969_v31 = vadd.f32 %v2032_v4, %v4009_v8  ;;  %v1888_v11 = vpop.f32.mrb[25].mxu0  ;;  %v2034_v12 = vpop.f32.mrb[25].mxu1 }
 0x2ca   : > { %v2954_v32 = vadd.f32 %v1888_v11, %v4013_v9  ;;  %v2970_v13 = vadd.f32 %v2034_v12, %v4017_v10  ;;  %v1890_v28 = vpop.f32.mrb[26].mxu0  ;;  %v2036_v14 = vpop.f32.mrb[26].mxu1  ;;  %2402 = vmatprep.mubr.bf16.mxu0 %v2088_v55  ;;  %2467 = vmatprep.mubr.bf16.mxu1 %v2090_v1 }
 0x2cb   : > { %v2955_v15 = vadd.f32 %v1890_v28, %v4005_v7  ;;  %v2971_v3 = vadd.f32 %v2036_v14, %v4009_v8  ;;  %v1892_v16 = vpop.f32.mrb[27].mxu0  ;;  %v2038_v17 = vpop.f32.mrb[27].mxu1  ;;  %2403 = vmatmul.mubr.bf16.gmra.mrb[36].mxu0 %v2087_v62  ;;  %2468 = vmatmul.mubr.bf16.gmra.mrb[36].mxu1 %v2089_v63  ;;  %v2067_v5 = vmax.f32 %v2953_v6, 0.0  ;;  %v2069_v18 = vmax.f32 %v2969_v31, 0.0 }
 0x2cc   : > { %v2956_v30 = vadd.f32 %v1892_v16, %v4013_v9  ;;  %v2972_v27 = vadd.f32 %v2038_v17, %v4017_v10  ;;  %v2068_v21 = vmax.f32 %v2954_v32, 0.0  ;;  %v2070_v22 = vmax.f32 %v2970_v13, 0.0 }
 0x2cd   : > { %v2071_v19 = vmax.f32 %v2955_v15, 0.0  ;;  %v2073_v20 = vmax.f32 %v2971_v3, 0.0 }
 0x2ce   : > { %v2072_v23 = vmax.f32 %v2956_v30, 0.0  ;;  %v2074_v24 = vmax.f32 %v2972_v27, 0.0 }
 0x2cf   : > { %v2091_v25 = vpack.c.bf16 %v2071_v19, %v2067_v5  ;;  %v2093_v26 = vpack.c.bf16 %v2073_v20, %v2069_v18 }
 0x2d0   : > { %v2092_v33 = vpack.c.bf16 %v2072_v23, %v2068_v21  ;;  %v2094_v35 = vpack.c.bf16 %v2074_v24, %v2070_v22  ;;  %v1896_v36 = vpop.f32.mrb[28].mxu0  ;;  %v2042_v38 = vpop.f32.mrb[28].mxu1 }
 0x2d1   : > { %v2957_v29 = vadd.f32 %v1896_v36, %v4005_v7  ;;  %v2973_v39 = vadd.f32 %v2042_v38, %v4009_v8  ;;  %v1898_v40 = vpop.f32.mrb[29].mxu0  ;;  %v2044_v41 = vpop.f32.mrb[29].mxu1 }
 0x2d2   : > { %v2958_v42 = vadd.f32 %v1898_v40, %v4013_v9  ;;  %v2974_v43 = vadd.f32 %v2044_v41, %v4017_v10  ;;  %v1900_v44 = vpop.f32.mrb[30].mxu0  ;;  %v2046_v45 = vpop.f32.mrb[30].mxu1  ;;  %2410 = vmatprep.mubr.bf16.mxu0 %v2092_v33  ;;  %2475 = vmatprep.mubr.bf16.mxu1 %v2094_v35 }
 0x2d3   : > { %v2959_v46 = vadd.f32 %v1900_v44, %v4005_v7  ;;  %v2975_v47 = vadd.f32 %v2046_v45, %v4009_v8  ;;  %v1902_v48 = vpop.f32.mrb[31].mxu0  ;;  %v2048_v49 = vpop.f32.mrb[31].mxu1  ;;  %2411 = vmatmul.mubr.bf16.gmra.mrb[40].mxu0 %v2091_v25  ;;  %2476 = vmatmul.mubr.bf16.gmra.mrb[40].mxu1 %v2093_v26  ;;  %v2075_v0 = vmax.f32 %v2957_v29, 0.0  ;;  %v2077_v37 = vmax.f32 %v2973_v39, 0.0 }
 0x2d4   : > { %v2960_v50 = vadd.f32 %v1902_v48, %v4013_v9  ;;  %v2976_v51 = vadd.f32 %v2048_v49, %v4017_v10  ;;  %v2076_v54 = vmax.f32 %v2958_v42, 0.0  ;;  %v2078_v56 = vmax.f32 %v2974_v43, 0.0  ;;  %v4054_v10 = vld [vmem:[%s4132_s6] ss:$0 sm:$0xff] }
 0x2d5   : > { %v2079_v52 = vmax.f32 %v2959_v46, 0.0  ;;  %v2081_v53 = vmax.f32 %v2975_v47, 0.0 }
 0x2d6   : > { %v2080_v57 = vmax.f32 %v2960_v50, 0.0  ;;  %v2082_v59 = vmax.f32 %v2976_v51, 0.0 }
 0x2d7   : > { %v2095_v7 = vpack.c.bf16 %v2079_v52, %v2075_v0  ;;  %v2097_v34 = vpack.c.bf16 %v2081_v53, %v2077_v37 }
 0x2d8   : > { %v2096_v8 = vpack.c.bf16 %v2080_v57, %v2076_v54  ;;  %v2098_v58 = vpack.c.bf16 %v2082_v59, %v2078_v56 }
 0x2da   : > { %2418 = vmatprep.mubr.bf16.mxu0 %v2096_v8  ;;  %2483 = vmatprep.mubr.bf16.mxu1 %v2098_v58 }
 0x2db   : > { %2419 = vmatmul.mubr.bf16.gmra.mrb[44].mxu0 %v2095_v7  ;;  %2484 = vmatmul.mubr.bf16.gmra.mrb[44].mxu1 %v2097_v34 }
 0x396   : > { %v2881_v9 = vpop.f32.mrb[32].mxu0  ;;  %v2921_v60 = vpop.f32.mrb[32].mxu1 }
 0x397   : > { %v2882_v61 = vpop.f32.mrb[33].mxu0  ;;  %v2922_v62 = vpop.f32.mrb[33].mxu1 }
 0x398   : > { %v2883_v63 = vadd.f32 %v2882_v61, %v2881_v9  ;;  %v2923_v55 = vadd.f32 %v2922_v62, %v2921_v60  ;;  %v2884_v1 = vpop.f32.mrb[34].mxu0  ;;  %v2924_v2 = vpop.f32.mrb[34].mxu1 }
 0x399   : > { %v2885_v4 = vpop.f32.mrb[35].mxu0  ;;  %v2925_v6 = vpop.f32.mrb[35].mxu1 }
 0x39a   : > { %v2397_v31 = vadd.f32 %v2883_v63, %v4054_v10  ;;  %v2886_v11 = vadd.f32 %v2885_v4, %v2884_v1  ;;  %v2926_v12 = vadd.f32 %v2925_v6, %v2924_v2 }
 0x39c   : > { %v2462_v32 = vadd.f32 %v2923_v55, %v2397_v31  ;;  %v2400_v13 = vadd.f32 %v2886_v11, %v4054_v10 }
 0x39e   : > { %2492 = vst [vmem:[%s4059_s19] sm:$0xff] %v2462_v32  ;;  %v2465_v28 = vadd.f32 %v2926_v12, %v2400_v13  ;;  %v2887_v14 = vpop.f32.mrb[36].mxu0  ;;  %v2927_v15 = vpop.f32.mrb[36].mxu1 }
 0x39f   : > { %v2888_v3 = vpop.f32.mrb[37].mxu0  ;;  %v2928_v16 = vpop.f32.mrb[37].mxu1 }
 0x3a0   : > { %2493 = vst [vmem:[%s4059_s19 + $0x8] sm:$0xff] %v2465_v28  ;;  %v2889_v17 = vadd.f32 %v2888_v3, %v2887_v14  ;;  %v2929_v30 = vadd.f32 %v2928_v16, %v2927_v15  ;;  %v2890_v27 = vpop.f32.mrb[38].mxu0  ;;  %v2930_v5 = vpop.f32.mrb[38].mxu1 }
 0x3a1   : > { %v2891_v18 = vpop.f32.mrb[39].mxu0  ;;  %v2931_v19 = vpop.f32.mrb[39].mxu1 }
 0x3a2   : > { %v2405_v20 = vadd.f32 %v2889_v17, %v4054_v10  ;;  %v2892_v21 = vadd.f32 %v2891_v18, %v2890_v27  ;;  %v2932_v22 = vadd.f32 %v2931_v19, %v2930_v5 }
 0x3a4   : > { %v2470_v23 = vadd.f32 %v2929_v30, %v2405_v20  ;;  %v2408_v24 = vadd.f32 %v2892_v21, %v4054_v10 }
 0x3a6   : > { %2494 = vst [vmem:[%s4059_s19 + $0x10] sm:$0xff] %v2470_v23  ;;  %v2473_v25 = vadd.f32 %v2932_v22, %v2408_v24  ;;  %v2893_v26 = vpop.f32.mrb[40].mxu0  ;;  %v2933_v33 = vpop.f32.mrb[40].mxu1 }
 0x3a7   : > { %v2894_v35 = vpop.f32.mrb[41].mxu0  ;;  %v2934_v36 = vpop.f32.mrb[41].mxu1 }
 0x3a8   : > { %2495 = vst [vmem:[%s4059_s19 + $0x18] sm:$0xff] %v2473_v25  ;;  %v2895_v38 = vadd.f32 %v2894_v35, %v2893_v26  ;;  %v2935_v29 = vadd.f32 %v2934_v36, %v2933_v33  ;;  %v2896_v39 = vpop.f32.mrb[42].mxu0  ;;  %v2936_v40 = vpop.f32.mrb[42].mxu1 }
 0x3a9   : > { %v2897_v41 = vpop.f32.mrb[43].mxu0  ;;  %v2937_v42 = vpop.f32.mrb[43].mxu1 }
 0x3aa   : > { %v2413_v43 = vadd.f32 %v2895_v38, %v4054_v10  ;;  %v2898_v44 = vadd.f32 %v2897_v41, %v2896_v39  ;;  %v2938_v45 = vadd.f32 %v2937_v42, %v2936_v40 }
 0x3ac   : > { %v2478_v46 = vadd.f32 %v2935_v29, %v2413_v43  ;;  %v2416_v47 = vadd.f32 %v2898_v44, %v4054_v10 }
 0x3ae   : > { %2496 = vst [vmem:[%s4059_s19 + $0x20] sm:$0xff] %v2478_v46  ;;  %v2481_v48 = vadd.f32 %v2938_v45, %v2416_v47  ;;  %v2899_v49 = vpop.f32.mrb[44].mxu0  ;;  %v2939_v50 = vpop.f32.mrb[44].mxu1 }
 0x3af   : > { %v2900_v51 = vpop.f32.mrb[45].mxu0  ;;  %v2940_v0 = vpop.f32.mrb[45].mxu1 }
 0x3b0   : > { %2497 = vst [vmem:[%s4059_s19 + $0x28] sm:$0xff] %v2481_v48  ;;  %v2901_v37 = vadd.f32 %v2900_v51, %v2899_v49  ;;  %v2941_v52 = vadd.f32 %v2940_v0, %v2939_v50  ;;  %v2902_v53 = vpop.f32.mrb[46].mxu0  ;;  %v2942_v54 = vpop.f32.mrb[46].mxu1 }
 0x3b1   : > { %v2903_v56 = vpop.f32.mrb[47].mxu0  ;;  %v2943_v57 = vpop.f32.mrb[47].mxu1 }
 0x3b2   : > { %v2421_v59 = vadd.f32 %v2901_v37, %v4054_v10  ;;  %v2904_v7 = vadd.f32 %v2903_v56, %v2902_v53  ;;  %v2944_v34 = vadd.f32 %v2943_v57, %v2942_v54 }
 0x3b4   : > { %v2486_v8 = vadd.f32 %v2941_v52, %v2421_v59  ;;  %v2424_v58 = vadd.f32 %v2904_v7, %v4054_v10 }
 0x3b6   : > { %2498 = vst [vmem:[%s4059_s19 + $0x30] sm:$0xff] %v2486_v8  ;;  %v2489_v9 = vadd.f32 %v2944_v34, %v2424_v58 }
 0x3b8   : > { %2499 = vst [vmem:[%s4059_s19 + $0x38] sm:$0xff] %v2489_v9 }
 0x3b9   : > { %3539 = shalt.err (!%p3536_p4)
}
 0x3ba   : > { %s3540_s15 = scalar_lea.hbm %s4080_s22, 1024  ;;  %s3544_s17 = scalar_lea.hbm %s4133_s7, 2048 }
 0x3bb   : > { %p3541_p9 = scmp.ne.s32.totalorder %s4080_s22, %s3540_s15  ;;  %p3545_p8 = scmp.lt.u32.totalorder %s4080_s22, %s4133_s7 }
 0x3bc   : > { %p3546_p13 = scmp.lt.u32.totalorder %s3544_s17, %s3540_s15  ;;  %p3548_p10 = scmp.lt.u32.totalorder %s3540_s15, %s4080_s22 }
 0x3bd   : > { %p3542_p0 = pnand %p3541_p9, %p3804_p5 }
 0x3be   : > { %p3547_p6 = por %p3546_p13, %p3545_p8 }
 0x3bf   : > { %p3543_p11 = pneg %p3542_p0 }
 0x3c0   : > { %p3549_p3 = por %p3548_p10, %p3547_p6 }
 0x3c2   : > { %p3550_p7 = pnand %p3549_p3, %p3543_p11 }
 0x3c4   : > { %3553 = shalt.err (!%p3550_p7)
}
 0x3c5   : > { %s3611_s11 = smov 128   ;;  %s3612_s10 = smov 8  }
 0x3c6   : > { %3023 = dma.vmem_to_hbm [thread:$0]  (%p3804_p5), %s4074_s29, 1024, %s4080_s22, %s2501_s12, %s3611_s11, %s3611_s11, %s3612_s10  }
 0x3c7 PF: > { %s4153_s30 = sld [smem:[#allocation15_spill]]  ;;  %s2529_s28 = sand.u32 1, %s3588_s24  }
 0x3c8   : > { %p4155_p1 = scmp.ge.s32.totalorder %s3600_s27, 2  ;;  %s2530_s9 = scalar_lea.sflag [#allocation4], %s2529_s28 }
 0x3cd   : > { %p4154_p12 = scmp.ne.s32.totalorder %s4153_s30, 0 }
 0x3cf   : > { %p3040_p2 = pnand %p4155_p1, %p4154_p12 }
 0x3d1   : > { %3583 = dma.done.wait (!%p3040_p2), %s2530_s9, 1024  }
 0x3d2   : > { %3585 = vsyncadd (!%p3040_p2), %s2530_s9, 4294966272  ;;  %p22_p4 = scmp.ge.s32.totalorder %s3790_s18, 4   ;;  %s4156_s24 = smov %s3592_s25 }
 0x3d3   : > { %s4157_s25 = smov %s3596_s26  ;;  %s4158_s26 = smov %s3800_s21 }
 0x3d4   : > { %s4159_s27 = smov %s3790_s18  ;;  %24 = sbr.rel (!%p22_p4) target bundleno = 7 (0x7), region = 105 }
 0x3db   :  { %2535 = vsyncpa [#allocation3], 1 }
 0x3dc   :  { %2537 = vsyncpa [#allocation3 + $0x1], 1 }
 0x3dd   :  { %2538 = vsyncpa [#allocation6], 1 }
 0x3de   :  { %2539 = vsyncpa [#allocation9], 1 }
 0x3df   :  { %2540 = vsyncpa [#allocation4], 1 }
 0x3e0   :  { %2542 = vsyncpa [#allocation4 + $0x1], 1 }

</bundles_post_ra>
